<compile_context>
chip_gen: v5e
topology: v5e:2x2
jax: 0.10.0
libtpu: 0.0.40
codegen_flags: <defaults>
</compile_context>

<pallas_src>
import jax
import jax.numpy as jnp
import numpy as np
from jax import lax
from jax.experimental import pallas as pl
from jax.experimental.pallas import tpu as pltpu


def _attention_kernel(x_full_ref, x_tile_ref, wq_ref, wk_ref, wv_ref,
                      bq_ref, bk_ref, bv_ref, gamma_ref,
                      o_ref, k_buf, v_buf):
    """One (batch, query-tile) grid step.  x is laid out (C, HW): C on sublanes,
    pixels on lanes."""
    qi = pl.program_id(1)

    # K / V projections once per batch element, reused for all query tiles.
    @pl.when(qi == 0)
    def _():
        xf = x_full_ref[0]                                                    # (C, HW)
        k_buf[...] = (jnp.dot(wk_ref[...], xf,
                              preferred_element_type=jnp.float32)
                      + bk_ref[...])                                          # (Cq, HW)
        v_buf[...] = (jnp.dot(wv_ref[...], xf,
                              preferred_element_type=jnp.float32)
                      + bv_ref[...])                                          # (C, HW)

    xt = x_tile_ref[0]                                                        # (C, tq)
    q = (jnp.dot(wq_ref[...], xt, preferred_element_type=jnp.float32)
         + bq_ref[...])                                                       # (Cq, tq)

    # energy_t[j, i] = <k_:,j , q_:,i>  (contract over Cq)  -> (HW, tq)
    energy_t = lax.dot_general(k_buf[...], q, (((0,), (0,)), ((), ())),
                               preferred_element_type=jnp.float32)

    # Softmax over keys (axis 0).  Stats come out as (1, tq), which broadcasts
    # directly over the (C, tq) output — normalization is applied AFTER the PV
    # matmul (C*tq multiplies instead of HW*tq), via an EUP reciprocal.
    m = jnp.max(energy_t, axis=0, keepdims=True)                              # (1, tq)
    p = jnp.exp(energy_t - m)                                                 # (HW, tq)
    l = jnp.sum(p, axis=0, keepdims=True)                                     # (1, tq)

    # out[c, i] = sum_j v[c, j] * p[j, i]   -> (C, tq)
    out = lax.dot_general(v_buf[...], p, (((1,), (0,)), ((), ())),
                          preferred_element_type=jnp.float32)

    inv_l = pl.reciprocal(l)                                                  # (1, tq)
    gamma = gamma_ref[0]                                                      # SMEM scalar
    o_ref[0] = (gamma * (out * inv_l) + xt).astype(o_ref.dtype)


def _pick_query_tile(hw):
    """Largest lane-aligned (multiple of 128) divisor of HW, capped at 512."""
    if hw <= 512:
        return hw
    for t in (512, 384, 256, 128):
        if hw % t == 0:
            return t
    return hw  # no aligned divisor: fall back to a single slab


def attention_block(x_nchw, wq, bq, wk, bk, wv, bv, gamma, *, tq=None):
    """x_nchw: (B, C, H, W) f32; wq/wk: (C//8, C); wv: (C, C); gamma: (1,)."""
    B, C, H, W = x_nchw.shape
    HW = H * W
    Cq = wq.shape[0]

    if tq is None:
        tq = _pick_query_tile(HW)
    if HW % tq != 0 or (tq != HW and tq % 128 != 0):
        tq = HW
    nq = HW // tq

    # NCHW -> (B, C, HW): a free reshape (no transpose / extra HBM pass).
    x_mat = x_nchw.reshape(B, C, HW)

    # Explicit scoped-VMEM limit (default is only 16 MiB on v5e / 32 MiB v6e).
    itemsize = 4
    est = ((2 * C * HW) + (4 * C * tq) + 2 * (2 * Cq * C + C * C)
           + (Cq + C) * HW + 4 * tq * HW) * itemsize
    vmem_limit = int(min(64 * 2**20, max(32 * 2**20, 2 * est)))

    out_mat = pl.pallas_call(
        _attention_kernel,
        out_shape=jax.ShapeDtypeStruct((B, C, HW), x_nchw.dtype),
        grid_spec=pltpu.PrefetchScalarGridSpec(
            num_scalar_prefetch=0,
            grid=(B, nq),
            in_specs=[
                pl.BlockSpec((1, C, HW), lambda b, q: (b, 0, 0)),   # x, full (resident per batch)
                pl.BlockSpec((1, C, tq), lambda b, q: (b, 0, q)),   # x, query tile
                pl.BlockSpec((Cq, C), lambda b, q: (0, 0)),         # Wq
                pl.BlockSpec((Cq, C), lambda b, q: (0, 0)),         # Wk
                pl.BlockSpec((C, C), lambda b, q: (0, 0)),          # Wv
                pl.BlockSpec((Cq, 1), lambda b, q: (0, 0)),         # bq
                pl.BlockSpec((Cq, 1), lambda b, q: (0, 0)),         # bk
                pl.BlockSpec((C, 1), lambda b, q: (0, 0)),          # bv
                pl.BlockSpec(memory_space=pltpu.MemorySpace.SMEM),  # gamma scalar
            ],
            out_specs=pl.BlockSpec((1, C, tq), lambda b, q: (b, 0, q)),
            scratch_shapes=[
                pltpu.VMEM((Cq, HW), jnp.float32),                  # K (per-batch)
                pltpu.VMEM((C, HW), jnp.float32),                   # V (per-batch)
            ],
        ),
        compiler_params=pltpu.CompilerParams(
            dimension_semantics=("parallel", "arbitrary"),
            vmem_limit_bytes=vmem_limit,
        ),
    )(x_mat, x_mat,
      wq, wk, wv,
      bq.reshape(Cq, 1), bk.reshape(Cq, 1), bv.reshape(C, 1),
      gamma.reshape(1))

    return out_mat.reshape(B, C, H, W)


def ref_attention_block(x, wq, bq, wk, bk, wv, bv, gamma):
    """Pure-JAX reference mirroring the PyTorch forward exactly."""
    B, C, H, W = x.shape
    HW = H * W
    hp = jax.lax.Precision.HIGHEST
    xm = x.reshape(B, C, HW)
    q = jnp.einsum('oc,bcn->bon', wq, xm, precision=hp) + bq[None, :, None]   # (B, Cq, HW)
    k = jnp.einsum('oc,bcn->bon', wk, xm, precision=hp) + bk[None, :, None]   # (B, Cq, HW)
    v = jnp.einsum('oc,bcn->bon', wv, xm, precision=hp) + bv[None, :, None]   # (B, C, HW)
    energy = jnp.einsum('bci,bcj->bij', q, k, precision=hp)                   # (B, HW, HW)
    attn = jax.nn.softmax(energy, axis=-1)
    out = jnp.einsum('bcj,bij->bci', v, attn, precision=hp)                   # (B, C, HW)
    return gamma * out.reshape(B, C, H, W) + x


if __name__ == "__main__":
    # in_channels must be >= 8 (C // 8 conv). HW = 256 so we can exercise tiling.
    B, C, H, W = 2, 16, 16, 16
    Cq = C // 8

    key = jax.random.PRNGKey(0)
    k_x, k_wq, k_bq, k_wk, k_bk, k_wv, k_bv = jax.random.split(key, 7)
    x = jax.random.normal(k_x, (B, C, H, W), jnp.float32)
    wq = 0.1 * jax.random.normal(k_wq, (Cq, C), jnp.float32)
    bq = 0.1 * jax.random.normal(k_bq, (Cq,), jnp.float32)
    wk = 0.1 * jax.random.normal(k_wk, (Cq, C), jnp.float32)
    bk = 0.1 * jax.random.normal(k_bk, (Cq,), jnp.float32)
    wv = 0.1 * jax.random.normal(k_wv, (C, C), jnp.float32)
    bv = 0.1 * jax.random.normal(k_bv, (C,), jnp.float32)
    # nn.Parameter(torch.zeros(1)) inits gamma to 0 (output == x); use a nonzero
    # value so the full attention path is exercised.
    gamma = jnp.array([0.5], jnp.float32)

    ref = ref_attention_block(x, wq, bq, wk, bk, wv, bv, gamma)

    # Single query tile (tq == HW).
    out1 = attention_block(x, wq, bq, wk, bk, wv, bv, gamma)
    jax.block_until_ready(out1)
    assert out1.shape == (B, C, H, W)
    assert np.allclose(np.asarray(out1), np.asarray(ref), rtol=1e-3, atol=1e-3)

    # Tiled query path (tq = 128 -> 2 tiles/batch): exercises the K/V scratch
    # reuse across query tiles and the lane-aligned tiled output store.
    out2 = attention_block(x, wq, bq, wk, bk, wv, bv, gamma, tq=128)
    jax.block_until_ready(out2)
    assert np.allclose(np.asarray(out2), np.asarray(ref), rtol=1e-3, atol=1e-3)

    print("KERNEL_OK")
</pallas_src>

<mosaic_0001>
module attributes {stable_mosaic.version = 11 : i64} {
  func.func @_attention_kernel(%arg0: i32, %arg1: i32, %arg2: memref<1x16x256xf32, #tpu.memory_space<vmem>>, %arg3: memref<1x16x256xf32, #tpu.memory_space<vmem>>, %arg4: memref<2x16xf32, #tpu.memory_space<vmem>>, %arg5: memref<2x16xf32, #tpu.memory_space<vmem>>, %arg6: memref<16x16xf32, #tpu.memory_space<vmem>>, %arg7: memref<2x1xf32, #tpu.memory_space<vmem>>, %arg8: memref<2x1xf32, #tpu.memory_space<vmem>>, %arg9: memref<16x1xf32, #tpu.memory_space<vmem>>, %arg10: memref<1xf32, #tpu.memory_space<smem>>, %arg11: memref<1x16x256xf32, #tpu.memory_space<vmem>>, %arg12: memref<2x256xf32, #tpu.memory_space<vmem>>, %arg13: memref<16x256xf32, #tpu.memory_space<vmem>>) attributes {dimension_semantics = [#tpu.dimension_semantics<parallel>, #tpu.dimension_semantics<arbitrary>], iteration_bounds = array<i64: 2, 1>, scalar_prefetch = 0 : i64, scratch_operands = 2 : i64, tpu.core_type = #tpu.core_type<tc>, window_params = [{transform_indices = @transform_0, window_bounds = array<i64: 1, 16, 256>}, {transform_indices = @transform_1, window_bounds = array<i64: 1, 16, 256>}, {pipeline_mode = #tpu.pipeline_mode<synchronous>, transform_indices = @transform_2, window_bounds = array<i64: 2, 16>}, {pipeline_mode = #tpu.pipeline_mode<synchronous>, transform_indices = @transform_3, window_bounds = array<i64: 2, 16>}, {pipeline_mode = #tpu.pipeline_mode<synchronous>, transform_indices = @transform_4, window_bounds = array<i64: 16, 16>}, {pipeline_mode = #tpu.pipeline_mode<synchronous>, transform_indices = @transform_5, window_bounds = array<i64: 2, 1>}, {pipeline_mode = #tpu.pipeline_mode<synchronous>, transform_indices = @transform_6, window_bounds = array<i64: 2, 1>}, {pipeline_mode = #tpu.pipeline_mode<synchronous>, transform_indices = @transform_7, window_bounds = array<i64: 16, 1>}, {transform_indices = @transform_8, window_bounds = array<i64: 1>}, {transform_indices = @transform_9, window_bounds = array<i64: 1, 16, 256>}]} {
    %c0_i32 = arith.constant 0 : i32
    %0 = arith.cmpi eq, %arg1, %c0_i32 : i32
    %1 = arith.extui %0 : i1 to i32
    %c0_i32_0 = arith.constant 0 : i32
    %2 = arith.cmpi ne, %1, %c0_i32_0 : i32
    scf.if %2 {
      %c0_19 = arith.constant 0 : index
      %c0_20 = arith.constant 0 : index
      %c0_21 = arith.constant 0 : index
      %31 = vector.load %arg2[%c0_19, %c0_20, %c0_21] : memref<1x16x256xf32, #tpu.memory_space<vmem>>, vector<1x16x256xf32>
      %32 = vector.shape_cast %31 : vector<1x16x256xf32> to vector<16x256xf32>
      %c0_22 = arith.constant 0 : index
      %c0_23 = arith.constant 0 : index
      %33 = vector.load %arg5[%c0_22, %c0_23] : memref<2x16xf32, #tpu.memory_space<vmem>>, vector<2x16xf32>
      %cst_24 = arith.constant dense<0.000000e+00> : vector<2x256xf32>
      %34 = tpu.matmul %33, %32, %cst_24 {dimension_numbers = #tpu.dot_dimension_numbers<[1], [0], [0], [1], [0, 0, 1, 1], [], []>} : vector<2x16xf32>, vector<16x256xf32>, vector<2x256xf32> -> vector<2x256xf32>
      %c0_25 = arith.constant 0 : index
      %c0_26 = arith.constant 0 : index
      %35 = vector.load %arg8[%c0_25, %c0_26] : memref<2x1xf32, #tpu.memory_space<vmem>>, vector<2x1xf32>
      %36 = vector.broadcast %35 : vector<2x1xf32> to vector<2x256xf32>
      %37 = arith.addf %34, %36 : vector<2x256xf32>
      %c0_27 = arith.constant 0 : index
      %c0_28 = arith.constant 0 : index
      %38 = vector.load %arg12[%c0_27, %c0_28] : memref<2x256xf32, #tpu.memory_space<vmem>>, vector<2x256xf32>
      tpu.vector_store %arg12[%c0_27, %c0_28], %37 {strides = array<i32>} : memref<2x256xf32, #tpu.memory_space<vmem>>, vector<2x256xf32>,
      %c0_29 = arith.constant 0 : index
      %c0_30 = arith.constant 0 : index
      %39 = vector.load %arg6[%c0_29, %c0_30] : memref<16x16xf32, #tpu.memory_space<vmem>>, vector<16x16xf32>
      %cst_31 = arith.constant dense<0.000000e+00> : vector<16x256xf32>
      %40 = tpu.matmul %39, %32, %cst_31 {dimension_numbers = #tpu.dot_dimension_numbers<[1], [0], [0], [1], [0, 0, 1, 1], [], []>} : vector<16x16xf32>, vector<16x256xf32>, vector<16x256xf32> -> vector<16x256xf32>
      %c0_32 = arith.constant 0 : index
      %c0_33 = arith.constant 0 : index
      %41 = vector.load %arg9[%c0_32, %c0_33] : memref<16x1xf32, #tpu.memory_space<vmem>>, vector<16x1xf32>
      %42 = vector.broadcast %41 : vector<16x1xf32> to vector<16x256xf32>
      %43 = arith.addf %40, %42 : vector<16x256xf32>
      %c0_34 = arith.constant 0 : index
      %c0_35 = arith.constant 0 : index
      %44 = vector.load %arg13[%c0_34, %c0_35] : memref<16x256xf32, #tpu.memory_space<vmem>>, vector<16x256xf32>
      tpu.vector_store %arg13[%c0_34, %c0_35], %43 {strides = array<i32>} : memref<16x256xf32, #tpu.memory_space<vmem>>, vector<16x256xf32>,
    } else {
    }
    %c0 = arith.constant 0 : index
    %c0_1 = arith.constant 0 : index
    %c0_2 = arith.constant 0 : index
    %3 = vector.load %arg3[%c0, %c0_1, %c0_2] : memref<1x16x256xf32, #tpu.memory_space<vmem>>, vector<1x16x256xf32>
    %4 = vector.shape_cast %3 : vector<1x16x256xf32> to vector<16x256xf32>
    %c0_3 = arith.constant 0 : index
    %c0_4 = arith.constant 0 : index
    %5 = vector.load %arg4[%c0_3, %c0_4] : memref<2x16xf32, #tpu.memory_space<vmem>>, vector<2x16xf32>
    %cst = arith.constant dense<0.000000e+00> : vector<2x256xf32>
    %6 = tpu.matmul %5, %4, %cst {dimension_numbers = #tpu.dot_dimension_numbers<[1], [0], [0], [1], [0, 0, 1, 1], [], []>} : vector<2x16xf32>, vector<16x256xf32>, vector<2x256xf32> -> vector<2x256xf32>
    %c0_5 = arith.constant 0 : index
    %c0_6 = arith.constant 0 : index
    %7 = vector.load %arg7[%c0_5, %c0_6] : memref<2x1xf32, #tpu.memory_space<vmem>>, vector<2x1xf32>
    %8 = vector.broadcast %7 : vector<2x1xf32> to vector<2x256xf32>
    %9 = arith.addf %6, %8 : vector<2x256xf32>
    %c0_7 = arith.constant 0 : index
    %c0_8 = arith.constant 0 : index
    %10 = vector.load %arg12[%c0_7, %c0_8] : memref<2x256xf32, #tpu.memory_space<vmem>>, vector<2x256xf32>
    %cst_9 = arith.constant dense<0.000000e+00> : vector<256x256xf32>
    %11 = tpu.matmul %10, %9, %cst_9 {dimension_numbers = #tpu.dot_dimension_numbers<[0], [0], [1], [1], [0, 1, 1, 1], [], []>} : vector<2x256xf32>, vector<2x256xf32>, vector<256x256xf32> -> vector<256x256xf32>
    %cst_10 = arith.constant dense<0xFF800000> : vector<256xf32>
    %12 = vector.multi_reduction <maximumf>, %11, %cst_10 [0] : vector<256x256xf32> to vector<256xf32>
    %13 = vector.shape_cast %12 : vector<256xf32> to vector<1x256xf32>
    %14 = vector.broadcast %13 : vector<1x256xf32> to vector<256x256xf32>
    %15 = arith.subf %11, %14 : vector<256x256xf32>
    %16 = math.exp %15 : vector<256x256xf32>
    %cst_11 = arith.constant dense<0.000000e+00> : vector<256xf32>
    %17 = vector.multi_reduction <add>, %16, %cst_11 [0] : vector<256x256xf32> to vector<256xf32>
    %18 = vector.shape_cast %17 : vector<256xf32> to vector<1x256xf32>
    %c0_12 = arith.constant 0 : index
    %c0_13 = arith.constant 0 : index
    %19 = vector.load %arg13[%c0_12, %c0_13] : memref<16x256xf32, #tpu.memory_space<vmem>>, vector<16x256xf32>
    %cst_14 = arith.constant dense<0.000000e+00> : vector<16x256xf32>
    %20 = tpu.matmul %19, %16, %cst_14 {dimension_numbers = #tpu.dot_dimension_numbers<[1], [0], [0], [1], [0, 0, 1, 1], [], []>} : vector<16x256xf32>, vector<256x256xf32>, vector<16x256xf32> -> vector<16x256xf32>
    %21 = tpu.reciprocal %18 : vector<1x256xf32> -> vector<1x256xf32>
    %c0_15 = arith.constant 0 : index
    %22 = memref.load %arg10[%c0_15] : memref<1xf32, #tpu.memory_space<smem>>
    %23 = vector.broadcast %21 : vector<1x256xf32> to vector<16x256xf32>
    %24 = arith.mulf %20, %23 : vector<16x256xf32>
    %25 = vector.broadcast %22 : f32 to vector<16x256xf32>
    %26 = arith.mulf %25, %24 : vector<16x256xf32>
    %27 = arith.addf %26, %4 : vector<16x256xf32>
    %c0_16 = arith.constant 0 : index
    %c0_17 = arith.constant 0 : index
    %c0_18 = arith.constant 0 : index
    %28 = vector.load %arg11[%c0_16, %c0_17, %c0_18] : memref<1x16x256xf32, #tpu.memory_space<vmem>>, vector<1x16x256xf32>
    %29 = vector.shape_cast %28 : vector<1x16x256xf32> to vector<16x256xf32>
    %30 = vector.shape_cast %27 : vector<16x256xf32> to vector<1x16x256xf32>
    tpu.vector_store %arg11[%c0_16, %c0_17, %c0_18], %30 {strides = array<i32>} : memref<1x16x256xf32, #tpu.memory_space<vmem>>, vector<1x16x256xf32>,
    return
  }
  func.func @transform_0(%arg0: i32, %arg1: i32) -> (i32, i32, i32) {
    %c0_i32 = arith.constant 0 : i32
    %c0_i32_0 = arith.constant 0 : i32
    %c0_i32_1 = arith.constant 0 : i32
    return %arg0, %c0_i32, %c0_i32_0 : i32, i32, i32
  }
  func.func @transform_1(%arg0: i32, %arg1: i32) -> (i32, i32, i32) {
    %c0_i32 = arith.constant 0 : i32
    %c0_i32_0 = arith.constant 0 : i32
    return %arg0, %c0_i32, %arg1 : i32, i32, i32
  }
  func.func @transform_2(%arg0: i32, %arg1: i32) -> (i32, i32) {
    %c0_i32 = arith.constant 0 : i32
    %c0_i32_0 = arith.constant 0 : i32
    %c0_i32_1 = arith.constant 0 : i32
    return %c0_i32, %c0_i32_0 : i32, i32
  }
  func.func @transform_3(%arg0: i32, %arg1: i32) -> (i32, i32) {
    %c0_i32 = arith.constant 0 : i32
    %c0_i32_0 = arith.constant 0 : i32
    %c0_i32_1 = arith.constant 0 : i32
    return %c0_i32, %c0_i32_0 : i32, i32
  }
  func.func @transform_4(%arg0: i32, %arg1: i32) -> (i32, i32) {
    %c0_i32 = arith.constant 0 : i32
    %c0_i32_0 = arith.constant 0 : i32
    %c0_i32_1 = arith.constant 0 : i32
    return %c0_i32, %c0_i32_0 : i32, i32
  }
  func.func @transform_5(%arg0: i32, %arg1: i32) -> (i32, i32) {
    %c0_i32 = arith.constant 0 : i32
    %c0_i32_0 = arith.constant 0 : i32
    %c0_i32_1 = arith.constant 0 : i32
    return %c0_i32, %c0_i32_0 : i32, i32
  }
  func.func @transform_6(%arg0: i32, %arg1: i32) -> (i32, i32) {
    %c0_i32 = arith.constant 0 : i32
    %c0_i32_0 = arith.constant 0 : i32
    %c0_i32_1 = arith.constant 0 : i32
    return %c0_i32, %c0_i32_0 : i32, i32
  }
  func.func @transform_7(%arg0: i32, %arg1: i32) -> (i32, i32) {
    %c0_i32 = arith.constant 0 : i32
    %c0_i32_0 = arith.constant 0 : i32
    %c0_i32_1 = arith.constant 0 : i32
    return %c0_i32, %c0_i32_0 : i32, i32
  }
  func.func @transform_8(%arg0: i32, %arg1: i32) -> i32 {
    %c0_i32 = arith.constant 0 : i32
    %c0_i32_0 = arith.constant 0 : i32
    return %c0_i32 : i32
  }
  func.func @transform_9(%arg0: i32, %arg1: i32) -> (i32, i32, i32) {
    %c0_i32 = arith.constant 0 : i32
    %c0_i32_0 = arith.constant 0 : i32
    return %arg0, %c0_i32, %arg1 : i32, i32, i32
  }
}

</mosaic_0001>

<bundles_post_ra>
// kernel: tpu_custom_call.1
= control target key start
LH: loop header
LB: loop body
LE: loop exit
PB: predicated region body
PF: predicated region fallthrough
CT: control target
= control target key end

     0   :  { %s2904_s0 = inlined_call_operand.hbm [shape: f32[2,16,256], index: 0, kind: input, shape index: {}]   ;;  %s2905_s1 = inlined_call_operand.hbm [shape: f32[2,16,256], index: 1, kind: input, shape index: {}]   ;;  %s2906_s2 = inlined_call_operand.vmem [shape: f32[2,16], index: 2, kind: input, shape index: {}]   ;;  %s2907_s3 = inlined_call_operand.vmem [shape: f32[2,16], index: 3, kind: input, shape index: {}]   ;;  %s2908_s4 = inlined_call_operand.vmem [shape: f32[16,16], index: 4, kind: input, shape index: {}]   ;;  %s2909_s5 = inlined_call_operand.vmem [shape: f32[2,1], index: 5, kind: input, shape index: {}]   ;;  %s2910_s6 = inlined_call_operand.vmem [shape: f32[2,1], index: 6, kind: input, shape index: {}]   ;;  %s2911_s7 = inlined_call_operand.vmem [shape: f32[16,1], index: 7, kind: input, shape index: {}]   ;;  %s2912_s8 = inlined_call_operand.<no memory space> [shape: f32[1], index: 8, kind: input, shape index: {}]   ;;  %s2913_s9 = inlined_call_operand.hbm [shape: f32[2,16,256], index: 9, kind: output, shape index: {}]  }
   0x1   :  { %2934 = sst [smem:[#allocation39_spill]] %s2904_s0 }
   0x2   :  { %14 = sst [smem:[#allocation4]] %s2912_s8 }
   0x3   :  { %15 = vsyncpa [#allocation6], 0 }
   0x4   :  { %17 = vsyncpa [#allocation6 + $0x1], 0 }
   0x5   :  { %18 = vsyncpa [#allocation9], 0 }
   0x6   :  { %20 = vsyncpa [#allocation9 + $0x1], 0 }
   0x7   :  { %21 = vsyncpa [#allocation7], 0 }
   0x8   :  { %23 = vsyncpa [#allocation7 + $0x1], 0  ;;  %s2133_s11 = smov 0   ;;  %s2135_s12 = smov 0  }
   0x9   :  { %s2137_s13 = smov 0   ;;  %s2139_s14 = smov 0  }
   0xa   :  { %s2141_s15 = smov 0   ;;  %s2143_s16 = smov 0  }
   0xb LB: > { %2935 = sst [smem:[#allocation14_spill]] %s2061_s13  ;;  %s1618_s8 = sadd.s32 4294967295, %s2073_s16   ;;  %s2073_s16 = sphi %s2143_s16, %s29_s16   ;;  %s2069_s15 = sphi %s2141_s15, %s2990_s15   ;;  %s2065_s14 = sphi %s2139_s14, %s2989_s14   ;;  %s2061_s13 = sphi %s2137_s13, %s2988_s13   ;;  %s2057_s12 = sphi %s2135_s12, %s2992_s12   ;;  %s2053_s11 = sphi %s2133_s11, %s2991_s11  }
   0xc   : > { %2936 = sst [smem:[#allocation15_spill]] %s2069_s15  ;;  %s1619_s17 = sadd.s32 4294967294, %s2073_s16  }
   0xd   : > { %s41_s18 = sadd.s32 1, %s2069_s15  ;;  %s48_s19 = sadd.s32 1, %s2061_s13 }
   0xe   : > { %p43_p0 = scmp.ge.s32.totalorder %s41_s18, 2  ;;  %p55_p1 = scmp.ne.s32.totalorder %s2061_s13, %s2057_s12 }
   0xf   : > { %p56_p2 = scmp.eq.s32.totalorder %s2073_s16, 0  ;;  %p61_p3 = scmp.ne.s32.totalorder %s2057_s12, %s2053_s11 }
  0x10   : > { %s2994_s18 = smov (%p43_p0, %s41_s18), 0  ;;  %p62_p5 = scmp.eq.s32.totalorder %s1618_s8, 0 }
  0x11   : > { %2937 = sst [smem:[#allocation16_spill]] %s2994_s18  ;;  %p2174_p4 = por %p56_p2, %p55_p1 }
  0x12   : > { %s45_s21 = ssub.s32 %s2069_s15, %s2994_s18  ;;  %p262_p6 = scmp.eq.s32.totalorder %s1618_s8, 1 }
  0x13   : > { %p46_p7 = scmp.eq.s32.totalorder %s45_s21, 0  ;;  %p2180_p8 = por %p62_p5, %p61_p3 }
  0x14   : > { %p2184_p9 = por %p262_p6, %p55_p1  ;;  %p268_p10 = scmp.eq.s32.totalorder %s1619_s17, 1 }
  0x15   : > { %s2189_s24 = scalar_select %p46_p7, %s2061_s13, %s48_s19  }
  0x16   : > { %p2191_p11 = por %p268_p10, %p61_p3  ;;  %p1621_p12 = scmp.ge.s32.totalorder %s2073_s16, 2 }
  0x17   : > { %2941 = sst [smem:[#allocation17_spill]] %s2189_s24  ;;  %p1733_p13 = scmp.lt.s32.totalorder %s2073_s16, 2 }
  0x18   : > { %s2942_s25 = scalar_select %p2191_p11, 1, 0 }
  0x19   : > { %s2198_s26 = sand.u32 1, %s2061_s13   ;;  %s1711_s28 = sshll.u32 %s2069_s15, 5 }
  0x1a   : > { %2943 = sst [smem:[#allocation18_spill]] %s2942_s25  ;;  %s1622_s27 = sshll.u32 %s2198_s26, 5 }
  0x1b   : > { %s2944_s0 = sld [smem:[#allocation39_spill]]  ;;  %s313_s8 = scalar_lea.vmem [#allocation5], %s1622_s27 }
  0x1c   : > { %s321_s17 = sshll.u32 %s313_s8, 4  ;;  %p2207_p0 = pnand %p1733_p13, %p2174_p4  ;;  %s322_s17 = int_to_ptr.vmem [resolvable:$true] %s321_s17 }
  0x1d   : > { %p1628_p1 = scmp.ge.s32.totalorder %s2073_s16, 1  ;;  %s310_s18 = scalar_lea.sflag [#allocation6], %s2198_s26 }
  0x1e   : > { %s2075_s15 = smov 256   ;;  %s2076_s24 = smov 16  }
  0x1f   : > { %p353_p2 = scmp.lt.s32.totalorder %s2073_s16, 3  ;;  %s335_s20 = scalar_lea.vmem [#allocation8], %s1622_s27 }
  0x20   : > { %s332_s13 = scalar_lea.sflag [#allocation9], %s2198_s26 }
  0x21   : > { %s318_s10 = scalar_lea.hbm %s2944_s0, %s1711_s28  ;;  %p354_p3 = pnand %p1628_p1, %p353_p2 }
  0x22   : > { %s319_s19 = sshll.u32 %s318_s10, 4  ;;  %s342_s10 = scalar_lea.hbm %s2905_s1, %s1711_s28  ;;  %s320_s19 = int_to_ptr.hbm [resolvable:$true] %s319_s19 }
  0x23   : > { %1725 = dma.hbm_to_vmem [thread:$0]  (!%p2207_p0), %s320_s19, 512, %s322_s17, %s310_s18, %s2075_s15, %s2075_s15, %s2076_s24  }
  0x24   : > { %s343_s8 = sshll.u32 %s342_s10, 4  ;;  %s345_s0 = sshll.u32 %s335_s20, 4  ;;  %s344_s8 = int_to_ptr.hbm [resolvable:$true] %s343_s8  ;;  %s346_s0 = int_to_ptr.vmem [resolvable:$true] %s345_s0 }
  0x25   : > { %1728 = dma.hbm_to_vmem [thread:$0]  (!%p2207_p0), %s344_s8, 512, %s346_s0, %s332_s13, %s2075_s15, %s2075_s15, %s2076_s24  }
  0x26   : > { %357 = sbr.rel (%p354_p3) target bundleno = 1020 (0x3fc), region = 56 }
  0x2b   : > { %s2223_s25 = sand.u32 1, %s2057_s12  }
  0x2c   : > { %s2226_s18 = sshll.u32 %s2223_s25, 5  ;;  %s360_s28 = scalar_lea.sflag [#allocation6], %s2223_s25 }
  0x2d   : > { %s363_s17 = scalar_lea.vmem [#allocation5], %s2226_s18 }
  0x2e   : > { %2040 = dma.done.wait (%p2180_p8), %s360_s28, 512  }
  0x2f   : > { %2042 = vsyncadd (%p2180_p8), %s360_s28, 4294966784  ;;  %s370_s0 = scalar_lea.sflag [#allocation9], %s2223_s25  ;;  %s2236_s13 = scalar_lea.vmem [#allocation8], %s2226_s18 }
  0x30   : > { %2044 = dma.done.wait (%p2180_p8), %s370_s0, 512  }
  0x31   : > { %2046 = vsyncadd (%p2180_p8), %s370_s0, 4294966784  ;;  %v2077_v0 = vmov 0   ;;  %v422_v1 = vld [vmem:[%s363_s17 + $0x10] sm:$0xff]  ;;  %v423_v2 = vld [vmem:[%s363_s17 + $0x18] sm:$0xff]  ;;  %vm431_vm0 = vcmask 130048   ;;  %vm478_vm1 = vcmask 1041408  }
  0x32   : > { %1789 = vset.pattern.permute.xlu0 %v2077_v0  ;;  %1790 = vset.pattern.permute.xlu2 %v2077_v0  ;;  %v420_v3 = vld [vmem:[%s363_s17] sm:$0xff]  ;;  %v421_v4 = vld [vmem:[%s363_s17 + $0x8] sm:$0xff]  ;;  %v424_v5 = vld [vmem:[%s2907_s3] sm:$0x3]  ;;  %vm678_vm2 = vcmask 15360   ;;  %s1472_s24 = sld [smem:[#allocation4]] }
  0x33   : > { %449 = vmatpush.msra.mxu2 %v422_v1  ;;  %469 = vmatpush.msra.mxu1 %v423_v2  ;;  %v554_v6 = vld [vmem:[%s2236_s13 + $0x10] sm:$0xff]  ;;  %v552_v7 = vld [vmem:[%s2236_s13] sm:$0xff]  ;;  %v555_v8 = vld [vmem:[%s2236_s13 + $0x18] sm:$0xff]  ;;  %s2856_s22 = scalar_lea.vmem [#allocation10], %s2226_s18  ;;  %s1713_s18 = sshll.u32 %s2065_s14, 5 }
  0x34   : > { %581 = vmatpush.msra.mxu0 %v554_v6  ;;  %539 = vmatpush.msra.mxu3 %v423_v2  ;;  %v556_v9 = vld [vmem:[%s2906_s2] sm:$0x3]  ;;  %v553_v11 = vld [vmem:[%s2236_s13 + $0x8] sm:$0xff]  ;;  %v483_v44 = vld [vmem:[%s2908_s4 + $0x8] sm:$0xff]  ;;  %s1504_s19 = scalar_lea.hbm %s2913_s9, %s1713_s18  ;;  %s1505_s21 = sshll.u32 %s2856_s22, 4  ;;  %s1506_s21 = int_to_ptr.vmem [resolvable:$true] %s1505_s21 }
  0x35   : > { %450 = vmatpush.msra.mxu2 %v420_v3  ;;  %470 = vmatpush.msra.mxu1 %v421_v4  ;;  %v425_v10 = vld [vmem:[%s2910_s6] sm:$0x3]  ;;  %v485_v52 = vld [vmem:[%s2911_s7 + $0x8] sm:$0xff]  ;;  %s1507_s29 = sshll.u32 %s1504_s19, 4  ;;  %s1491_s14 = scalar_lea.sflag [#allocation7], %s2223_s25  ;;  %s1508_s29 = int_to_ptr.hbm [resolvable:$true] %s1507_s29 }
  0x36   : > { %1632 = vmatmul.msk.f32.vlgmr.msra.gmra.mxu2 %vm431_vm0, %v424_v5  ;;  %1633 = vmatmul.msk.f32.vlgmr.msra.gmra.mxu1 %vm431_vm0, %v424_v5  ;;  %v557_v12 = vld [vmem:[%s2909_s5] sm:$0x3]  ;;  %s2001_s30 = sshra.s32 %s1508_s29, 4  ;;  %s2007_s28 = scalar_lea.hbm %s2913_s9, 64  ;;  %s2002_s30 = int_to_ptr.hbm [resolvable:$true] %s2001_s30 }
  0x37   : > { %582 = vmatpush.msra.mxu0 %v552_v7  ;;  %601 = vmatpush.msrb.mxu1 %v555_v8  ;;  %v482_v42 = vld [vmem:[%s2908_s4] sm:$0xff]  ;;  %s2003_s10 = scalar_lea.hbm %s2002_s30, 32  ;;  %p2008_p7 = scmp.lt.s32.totalorder %s2002_s30, %s2913_s9 }
  0x38   : > { %1638 = vmatmul.msk.f32.vlgmr.msra.gmra.mxu0 %vm431_vm0, %v556_v9  ;;  %428 = vperm.xlu0 %1789, %v425_v10   ;;  %v484_v50 = vld [vmem:[%s2911_s7] sm:$0xff]  ;;  %p2004_p4 = scmp.ne.s32.totalorder %s2002_s30, %s2003_s10  ;;  %p2009_p8 = scmp.lt.s32.totalorder %s2007_s28, %s2003_s10 }
  0x39   : > { %602 = vmatpush.msrb.mxu1 %v553_v11  ;;  %516 = vmatpush.msrb.mxu2 %v422_v1 }
  0x3a   : > { %540 = vmatpush.msra.mxu3 %v421_v4  ;;  %488 = vperm.xlu2 %1790, %v484_v50   ;;  %p2005_p5 = pnand %p2004_p4, %p2184_p9  ;;  %p2010_p10 = por %p2009_p8, %p2008_p7 }
  0x3b   : > { %517 = vmatpush.msrb.mxu2 %v420_v3  ;;  %1636 = vmatmul.msk.f32.vlgmr.msra.gmra.mxu3 %vm431_vm0, %v482_v42 }
  0x3c   : > { %p2006_p6 = pneg %p2005_p5 }
  0x3e   : > { %1639 = vmatmul.msk.f32.vlgmr.msrb.gmra.mxu1 %vm431_vm0, %v556_v9  ;;  %1634 = vmatmul.msk.f32.vlgmr.msrb.gmra.mxu2 %vm431_vm0, %v482_v42  ;;  %p2011_p13 = pnand %p2010_p10, %p2006_p6 }
  0x40   : > { %560 = vperm.xlu0 %1789, %v557_v12  }
  0x42   : > { %493 = vperm.xlu2 %1790, %v485_v52  }
  0x43   : > { %1637 = vmatmul.msk.f32.gmra.mxu3 %vm431_vm0, %v483_v44 }
  0x46   : > { %1635 = vmatmul.msk.f32.gmra.mxu2 %vm431_vm0, %v483_v44 }
  0xaa   : > { %v429_v13 = vpop.permute.xlu0 %428 }
  0xb2   : > { %v561_v15 = vpop.permute.xlu0 %560 }
  0xb3   : > { %v472_v14 = vpop.f32.mrf.mxu1 }
  0xb4   : > { %v473_v16 = vadd.f32 %v472_v14, %v429_v13 }
  0xb5   : > { %v584_v17 = vpop.f32.mrf.mxu0 }
  0xb6   : > { %v585_v18 = vadd.f32 %v584_v17, %v561_v15  ;;  %v477_v19 = vrot.slane %v473_v16, 6 }
  0xb8   : > { %1640 = vmatpush.msk.msrb.mxu0 %vm478_vm1, %v585_v18  ;;  %1714 = vmatpush.msk.msra.mxu2 %vm478_vm1, %v585_v18 }
  0xb9   : > { %v452_v20 = vpop.f32.mrf.mxu2 }
  0xba   : > { %v453_v21 = vadd.f32 %v452_v20, %v429_v13 }
  0xbb   : > { %v604_v22 = vpop.f32.mrf.mxu1 }
  0xbc   : > { %v479_v23 = vsel %vm478_vm1, %v453_v21, %v477_v19  ;;  %v605_v24 = vadd.f32 %v604_v22, %v561_v15 }
  0xbd   : > { %481 = vst [vmem:[#allocation2] sm:$0xf] %v479_v23 }
  0xbe   : > { %1673 = vmatpush.msk.msra.mxu1 %vm478_vm1, %v605_v24  ;;  %1715 = vmatpush.msk.msrb.mxu3 %vm478_vm1, %v605_v24  ;;  %v2372_v15 = vpop.f32.mrf.mxu3 }
  0xbf   : > { %2951 = vst [vmem:[#allocation24_spill] sm:$0xff] %v2372_v15 }
  0xc1   : > { %v2378_v18 = vpop.f32.mrf.mxu2 }
  0xc2   : > { %2952 = vst [vmem:[#allocation25_spill] sm:$0xff] %v2378_v18 }
  0xc4   : > { %v607_v25 = vld [vmem:[#allocation2] sm:$0xf] }
  0xc5   : > { %609 = vst [vmem:[#allocation1] ss:$4 sm:$0xff] %v607_v25 }
  0xc6   : > { %v2380_v19 = vpop.f32.mrf.mxu3 }
  0xc7   : > { %2953 = vst [vmem:[#allocation26_spill] sm:$0xff] %v2380_v19 }
  0xc9   : > { %v2386_v22 = vpop.f32.mrf.mxu2 }
  0xca   : > { %2955 = vst [vmem:[#allocation28_spill] sm:$0xff] %v2386_v22 }
  0xcc   : > { %v610_v26 = vld.sshfl [vmem:[#allocation1] sm:$0xff pattern:$0x73625140]  ;;  %v611_v27 = vld.sshfl [vmem:[#allocation1 + $0x8] sm:$0xff pattern:$0x73625140] }
  0xcd   : > { %614 = vxpose.xlu1.b32.start.end [1/1] (short) %v610_v26, 128 }
 0x14d   : > { %646 = vxpose.xlu1.b32.start.end [1/1] (short) %v611_v27, 128 }
 0x171   : > { %v630_v28 = vpop.trf.xlu1 }
 0x172   : > { %1641 = vmatmul.msk.f32.vlgmr.msrb.gmra.mxu0 %vm678_vm2, %v630_v28  ;;  %1674 = vmatmul.msk.f32.vlgmr.msra.gmra.mxu1 %vm678_vm2, %v630_v28 }
 0x179   : > { %v631_v29 = vpop.trf.xlu1 }
 0x17a   : > { %1642 = vmatmul.msk.f32.gmra.mxu0 %vm678_vm2, %v631_v29  ;;  %1675 = vmatmul.msk.f32.gmra.mxu1 %vm678_vm2, %v631_v29 }
 0x181   : > { %v632_v30 = vpop.trf.xlu1 }
 0x182   : > { %1643 = vmatmul.msk.f32.gmra.mxu0 %vm678_vm2, %v632_v30  ;;  %1676 = vmatmul.msk.f32.gmra.mxu1 %vm678_vm2, %v632_v30 }
 0x189   : > { %v633_v31 = vpop.trf.xlu1 }
 0x18a   : > { %1644 = vmatmul.msk.f32.gmra.mxu0 %vm678_vm2, %v633_v31  ;;  %1677 = vmatmul.msk.f32.gmra.mxu1 %vm678_vm2, %v633_v31 }
 0x191   : > { %v634_v32 = vpop.trf.xlu1 }
 0x192   : > { %1645 = vmatmul.msk.f32.gmra.mxu0 %vm678_vm2, %v634_v32  ;;  %1678 = vmatmul.msk.f32.gmra.mxu1 %vm678_vm2, %v634_v32 }
 0x199   : > { %v635_v33 = vpop.trf.xlu1 }
 0x19a   : > { %1646 = vmatmul.msk.f32.gmra.mxu0 %vm678_vm2, %v635_v33  ;;  %1679 = vmatmul.msk.f32.gmra.mxu1 %vm678_vm2, %v635_v33 }
 0x1a1   : > { %v636_v34 = vpop.trf.xlu1 }
 0x1a2   : > { %1647 = vmatmul.msk.f32.gmra.mxu0 %vm678_vm2, %v636_v34  ;;  %1680 = vmatmul.msk.f32.gmra.mxu1 %vm678_vm2, %v636_v34 }
 0x1a9   : > { %v637_v35 = vpop.trf.xlu1 }
 0x1aa   : > { %1648 = vmatmul.msk.f32.gmra.mxu0 %vm678_vm2, %v637_v35  ;;  %1681 = vmatmul.msk.f32.gmra.mxu1 %vm678_vm2, %v637_v35 }
 0x1b1   : > { %v638_v36 = vpop.trf.xlu1 }
 0x1b2   : > { %1649 = vmatmul.msk.f32.gmra.mxu0 %vm678_vm2, %v638_v36  ;;  %1682 = vmatmul.msk.f32.gmra.mxu1 %vm678_vm2, %v638_v36 }
 0x1b9   : > { %v639_v37 = vpop.trf.xlu1 }
 0x1ba   : > { %1650 = vmatmul.msk.f32.gmra.mxu0 %vm678_vm2, %v639_v37  ;;  %1683 = vmatmul.msk.f32.gmra.mxu1 %vm678_vm2, %v639_v37 }
 0x1c1   : > { %v640_v38 = vpop.trf.xlu1 }
 0x1c2   : > { %1651 = vmatmul.msk.f32.gmra.mxu0 %vm678_vm2, %v640_v38  ;;  %1684 = vmatmul.msk.f32.gmra.mxu1 %vm678_vm2, %v640_v38 }
 0x1c9   : > { %v641_v39 = vpop.trf.xlu1 }
 0x1ca   : > { %1652 = vmatmul.msk.f32.gmra.mxu0 %vm678_vm2, %v641_v39  ;;  %1685 = vmatmul.msk.f32.gmra.mxu1 %vm678_vm2, %v641_v39 }
 0x1d1   : > { %v642_v40 = vpop.trf.xlu1 }
 0x1d2   : > { %1653 = vmatmul.msk.f32.gmra.mxu0 %vm678_vm2, %v642_v40  ;;  %1686 = vmatmul.msk.f32.gmra.mxu1 %vm678_vm2, %v642_v40 }
 0x1d9   : > { %v643_v41 = vpop.trf.xlu1 }
 0x1da   : > { %1654 = vmatmul.msk.f32.gmra.mxu0 %vm678_vm2, %v643_v41  ;;  %1687 = vmatmul.msk.f32.gmra.mxu1 %vm678_vm2, %v643_v41 }
 0x1e1   : > { %v644_v43 = vpop.trf.xlu1 }
 0x1e2   : > { %1655 = vmatmul.msk.f32.gmra.mxu0 %vm678_vm2, %v644_v43  ;;  %1688 = vmatmul.msk.f32.gmra.mxu1 %vm678_vm2, %v644_v43 }
 0x1e9   : > { %v645_v45 = vpop.trf.xlu1 }
 0x1ea   : > { %1656 = vmatmul.msk.f32.gmra.mxu0 %vm678_vm2, %v645_v45  ;;  %1689 = vmatmul.msk.f32.gmra.mxu1 %vm678_vm2, %v645_v45 }
 0x1ef   : > { %v2322_v54 = vpop.f32.mrf.mxu0  ;;  %v2336_v61 = vpop.f32.mrf.mxu1 }
 0x1f1   : > { %v662_v46 = vpop.trf.xlu1 }
 0x1f2   : > { %1657 = vmatmul.msk.f32.gmra.mxu0 %vm678_vm2, %v662_v46  ;;  %1690 = vmatmul.msk.f32.gmra.mxu1 %vm678_vm2, %v662_v46 }
 0x1f7   : > { %v2326_v57 = vpop.f32.mrf.mxu0  ;;  %v2342_v0 = vpop.f32.mrf.mxu1 }
 0x1f8   : > { %2946 = vst [vmem:[#allocation19_spill] sm:$0xff] %v2342_v0 }
 0x1f9   : > { %v663_v47 = vpop.trf.xlu1 }
 0x1fa   : > { %1658 = vmatmul.msk.f32.gmra.mxu0 %vm678_vm2, %v663_v47  ;;  %1691 = vmatmul.msk.f32.gmra.mxu1 %vm678_vm2, %v663_v47 }
 0x1ff   : > { %v2332_v59 = vpop.f32.mrf.mxu0  ;;  %v2348_v4 = vpop.f32.mrf.mxu1 }
 0x200   : > { %2947 = vst [vmem:[#allocation20_spill] sm:$0xff] %v2348_v4 }
 0x201   : > { %v664_v48 = vpop.trf.xlu1 }
 0x202   : > { %1659 = vmatmul.msk.f32.gmra.mxu0 %vm678_vm2, %v664_v48  ;;  %1692 = vmatmul.msk.f32.gmra.mxu1 %vm678_vm2, %v664_v48 }
 0x207   : > { %v2338_v62 = vpop.f32.mrf.mxu0  ;;  %v2356_v7 = vpop.f32.mrf.mxu1 }
 0x208   : > { %2949 = vst [vmem:[#allocation22_spill] sm:$0xff] %v2356_v7 }
 0x209   : > { %v665_v49 = vpop.trf.xlu1 }
 0x20a   : > { %1660 = vmatmul.msk.f32.gmra.mxu0 %vm678_vm2, %v665_v49  ;;  %1693 = vmatmul.msk.f32.vlgmr.msrb.gmra.mxu3 %vm678_vm2, %v665_v49 }
 0x20f   : > { %v2344_v1 = vpop.f32.mrf.mxu0  ;;  %v2362_v10 = vpop.f32.mrf.mxu1 }
 0x211   : > { %v666_v51 = vpop.trf.xlu1 }
 0x212   : > { %1661 = vmatmul.msk.f32.vlgmr.msra.gmra.mxu2 %vm678_vm2, %v666_v51  ;;  %1694 = vmatmul.msk.f32.gmra.mxu3 %vm678_vm2, %v666_v51 }
 0x217   : > { %v2350_v5 = vpop.f32.mrf.mxu0  ;;  %v2368_v13 = vpop.f32.mrf.mxu1 }
 0x218   : > { %2948 = vst [vmem:[#allocation21_spill] sm:$0xff] %v2350_v5 }
 0x219   : > { %v667_v53 = vpop.trf.xlu1 }
 0x21a   : > { %1662 = vmatmul.msk.f32.gmra.mxu2 %vm678_vm2, %v667_v53  ;;  %1695 = vmatmul.msk.f32.gmra.mxu3 %vm678_vm2, %v667_v53  ;;  %v1008_v53 = vmax.f32 %v2322_v54, %v2332_v59 }
 0x21f   : > { %v2358_v8 = vpop.f32.mrf.mxu0  ;;  %v2374_v16 = vpop.f32.mrf.mxu1 }
 0x220   : > { %2950 = vst [vmem:[#allocation23_spill] sm:$0xff] %v2358_v8 }
 0x221   : > { %v668_v55 = vpop.trf.xlu1 }
 0x222   : > { %1663 = vmatmul.msk.f32.gmra.mxu2 %vm678_vm2, %v668_v55  ;;  %1696 = vmatmul.msk.f32.gmra.mxu3 %vm678_vm2, %v668_v55  ;;  %v1009_v55 = vmax.f32 %v2326_v57, %v2338_v62 }
 0x227   : > { %v2364_v11 = vpop.f32.mrf.mxu0  ;;  %v2382_v20 = vpop.f32.mrf.mxu1 }
 0x228   : > { %2954 = vst [vmem:[#allocation27_spill] sm:$0xff] %v2382_v20 }
 0x229   : > { %v669_v56 = vpop.trf.xlu1 }
 0x22a   : > { %1664 = vmatmul.msk.f32.gmra.mxu2 %vm678_vm2, %v669_v56  ;;  %1697 = vmatmul.msk.f32.gmra.mxu3 %vm678_vm2, %v669_v56  ;;  %v1010_v56 = vmax.f32 %v1008_v53, %v2344_v1 }
 0x22f   : > { %v2370_v14 = vpop.f32.mrf.mxu0  ;;  %v2390_v24 = vpop.f32.mrf.mxu1 }
 0x230   : > { %2956 = vst [vmem:[#allocation29_spill] sm:$0xff] %v2390_v24 }
 0x231   : > { %v670_v58 = vpop.trf.xlu1 }
 0x232   : > { %1665 = vmatmul.msk.f32.gmra.mxu2 %vm678_vm2, %v670_v58  ;;  %1698 = vmatmul.msk.f32.gmra.mxu3 %vm678_vm2, %v670_v58  ;;  %v1011_v58 = vmax.f32 %v1009_v55, %v2350_v5 }
 0x237   : > { %v2376_v17 = vpop.f32.mrf.mxu0  ;;  %v2398_v28 = vpop.f32.mrf.mxu1 }
 0x238   : > { %2958 = vst [vmem:[#allocation31_spill] sm:$0xff] %v2398_v28 }
 0x239   : > { %v671_v60 = vpop.trf.xlu1 }
 0x23a   : > { %1666 = vmatmul.msk.f32.gmra.mxu2 %vm678_vm2, %v671_v60  ;;  %1699 = vmatmul.msk.f32.gmra.mxu3 %vm678_vm2, %v671_v60 }
 0x23f   : > { %v2384_v21 = vpop.f32.mrf.mxu0  ;;  %v2406_v32 = vpop.f32.mrf.mxu1 }
 0x241   : > { %v672_v63 = vpop.trf.xlu1 }
 0x242   : > { %1667 = vmatmul.msk.f32.gmra.mxu2 %vm678_vm2, %v672_v63  ;;  %1700 = vmatmul.msk.f32.gmra.mxu3 %vm678_vm2, %v672_v63 }
 0x247   : > { %v2392_v25 = vpop.f32.mrf.mxu0  ;;  %v2414_v36 = vpop.f32.mrf.mxu1 }
 0x248   : > { %2957 = vst [vmem:[#allocation30_spill] sm:$0xff] %v2392_v25 }
 0x249   : > { %v673_v2 = vpop.trf.xlu1  ;;  %2960 = vst [vmem:[#allocation33_spill] sm:$0xff] %v2414_v36 }
 0x24a   : > { %1668 = vmatmul.msk.f32.gmra.mxu2 %vm678_vm2, %v673_v2  ;;  %1701 = vmatmul.msk.f32.gmra.mxu3 %vm678_vm2, %v673_v2 }
 0x24f   : > { %v2400_v29 = vpop.f32.mrf.mxu0  ;;  %v2424_v41 = vpop.f32.mrf.mxu1 }
 0x250   : > { %2959 = vst [vmem:[#allocation32_spill] sm:$0xff] %v2400_v29 }
 0x251   : > { %v674_v3 = vpop.trf.xlu1  ;;  %2962 = vst [vmem:[#allocation35_spill] sm:$0xff] %v2424_v41 }
 0x252   : > { %1669 = vmatmul.msk.f32.gmra.mxu2 %vm678_vm2, %v674_v3  ;;  %1702 = vmatmul.msk.f32.gmra.mxu3 %vm678_vm2, %v674_v3 }
 0x257   : > { %v2408_v33 = vpop.f32.mrf.mxu0  ;;  %v2432_v45 = vpop.f32.mrf.mxu1 }
 0x259   : > { %v675_v6 = vpop.trf.xlu1 }
 0x25a   : > { %1670 = vmatmul.msk.f32.gmra.mxu2 %vm678_vm2, %v675_v6  ;;  %1703 = vmatmul.msk.f32.gmra.mxu3 %vm678_vm2, %v675_v6  ;;  %v1012_v6 = vmax.f32 %v1010_v56, %v2358_v8 }
 0x25f   : > { %v2416_v37 = vpop.f32.mrf.mxu0  ;;  %v2440_v49 = vpop.f32.mrf.mxu1 }
 0x261   : > { %v676_v9 = vpop.trf.xlu1 }
 0x262   : > { %1671 = vmatmul.msk.f32.gmra.mxu2 %vm678_vm2, %v676_v9  ;;  %1704 = vmatmul.msk.f32.gmra.mxu3 %vm678_vm2, %v676_v9  ;;  %v1013_v9 = vmax.f32 %v1011_v58, %v2364_v11 }
 0x264   : > { %v1015_v19 = vmax.f32 %v1013_v9, %v2376_v17 }
 0x266   : > { %v1017_v55 = vmax.f32 %v1015_v19, %v2392_v25  ;;  %v1045_v25 = vmax.f32 %v2336_v61, %v2348_v4 }
 0x267   : > { %v2426_v42 = vpop.f32.mrf.mxu0  ;;  %v2454_v60 = vpop.f32.mrf.mxu1 }
 0x268   : > { %v1019_v22 = vmax.f32 %v1017_v55, %v2408_v33  ;;  %v1046_v55 = vmax.f32 %v2342_v0, %v2356_v7 }
 0x269   : > { %v677_v12 = vpop.trf.xlu1 }
 0x26a   : > { %1672 = vmatmul.msk.f32.gmra.mxu2 %vm678_vm2, %v677_v12  ;;  %1705 = vmatmul.msk.f32.gmra.mxu3 %vm678_vm2, %v677_v12  ;;  %v1014_v12 = vmax.f32 %v1012_v6, %v2370_v14  ;;  %v1021_v56 = vmax.f32 %v1019_v22, %v2426_v42 }
 0x26c   : > { %v1016_v53 = vmax.f32 %v1014_v12, %v2384_v21 }
 0x26e   : > { %v1018_v15 = vmax.f32 %v1016_v53, %v2400_v29 }
 0x26f   : > { %v2434_v46 = vpop.f32.mrf.mxu0  ;;  %v2474_v8 = vpop.f32.mrf.mxu1 }
 0x270   : > { %v1020_v5 = vmax.f32 %v1018_v15, %v2416_v37 }
 0x272   : > { %v1022_v9 = vmax.f32 %v1020_v5, %v2434_v46  ;;  %v1048_v5 = vmax.f32 %v1046_v55, %v2368_v13 }
 0x277   : > { %v2442_v50 = vpop.f32.mrf.mxu0 }
 0x278   : > { %v1023_v19 = vmax.f32 %v1021_v56, %v2442_v50 }
 0x27f   : > { %v2456_v63 = vpop.f32.mrf.mxu0 }
 0x280   : > { %v1024_v12 = vmax.f32 %v1022_v9, %v2456_v63 }
 0x287   : > { %v2476_v58 = vpop.f32.mrf.mxu0 }
 0x288   : > { %2964 = vst [vmem:[#allocation37_spill] sm:$0xff] %v2476_v58  ;;  %v1025_v53 = vmax.f32 %v1023_v19, %v2476_v58  ;;  %v1047_v19 = vmax.f32 %v1045_v25, %v2362_v10  ;;  %v1050_v58 = vmax.f32 %v1048_v5, %v2382_v20 }
 0x28a   : > { %v1049_v4 = vmax.f32 %v1047_v19, %v2374_v16  ;;  %v1052_v55 = vmax.f32 %v1050_v58, %v2398_v28 }
 0x28c   : > { %v1051_v25 = vmax.f32 %v1049_v4, %v2390_v24  ;;  %v1054_v5 = vmax.f32 %v1052_v55, %v2414_v36 }
 0x28d   : > { %v2388_v23 = vpop.f32.mrf.mxu3 }
 0x28e   : > { %v1056_v19 = vmax.f32 %v1054_v5, %v2432_v45 }
 0x290   : > { %v1058_v4 = vmax.f32 %v1056_v19, %v2454_v60 }
 0x295   : > { %v2394_v26 = vpop.f32.mrf.mxu2  ;;  %v2396_v27 = vpop.f32.mrf.mxu3 }
 0x296   : > { %v1026_v15 = vmax.f32 %v1024_v12, %v2394_v26 }
 0x29d   : > { %v2402_v30 = vpop.f32.mrf.mxu2  ;;  %v2404_v31 = vpop.f32.mrf.mxu3 }
 0x29e   : > { %v1027_v22 = vmax.f32 %v1025_v53, %v2402_v30  ;;  %v2499_v53 = vpop.f32.mrf.mxu1 }
 0x29f   : > { %2965 = vst [vmem:[#allocation38_spill] sm:$0xff] %v2499_v53 }
 0x2a5   : > { %v2410_v34 = vpop.f32.mrf.mxu2  ;;  %v2412_v35 = vpop.f32.mrf.mxu3 }
 0x2a6   : > { %v1028_v56 = vmax.f32 %v1026_v15, %v2410_v34  ;;  %v2521_v36 = vpop.f32.mrf.mxu1 }
 0x2ad   : > { %v2418_v38 = vpop.f32.mrf.mxu2  ;;  %v2420_v39 = vpop.f32.mrf.mxu3 }
 0x2ae   : > { %v1029_v9 = vmax.f32 %v1027_v22, %v2418_v38 }
 0x2b5   : > { %v2422_v40 = vpop.f32.mrf.mxu2  ;;  %v2428_v43 = vpop.f32.mrf.mxu3 }
 0x2b6   : > { %2961 = vst [vmem:[#allocation34_spill] sm:$0xff] %v2422_v40  ;;  %v1030_v7 = vmax.f32 %v1028_v56, %v2422_v40  ;;  %v1053_v40 = vmax.f32 %v1051_v25, %v2406_v32 }
 0x2b7   : > { %2963 = vst [vmem:[#allocation36_spill] sm:$0xff] %v2428_v43 }
 0x2bd   : > { %v2430_v44 = vpop.f32.mrf.mxu2  ;;  %v2436_v47 = vpop.f32.mrf.mxu3 }
 0x2be   : > { %v1031_v12 = vmax.f32 %v1029_v9, %v2430_v44 }
 0x2c5   : > { %v2438_v48 = vpop.f32.mrf.mxu2  ;;  %v2444_v51 = vpop.f32.mrf.mxu3 }
 0x2c6   : > { %v1032_v15 = vmax.f32 %v1030_v7, %v2438_v48 }
 0x2cd   : > { %v2446_v52 = vpop.f32.mrf.mxu2  ;;  %v2458_v2 = vpop.f32.mrf.mxu3 }
 0x2ce   : > { %v1033_v22 = vmax.f32 %v1031_v12, %v2446_v52  ;;  %v1055_v12 = vmax.f32 %v1053_v40, %v2424_v41 }
 0x2d0   : > { %v1057_v55 = vmax.f32 %v1055_v12, %v2440_v49 }
 0x2d2   : > { %v1059_v25 = vmax.f32 %v1057_v55, %v2474_v8 }
 0x2d5   : > { %v2460_v3 = vpop.f32.mrf.mxu2  ;;  %v2478_v6 = vpop.f32.mrf.mxu3 }
 0x2d6   : > { %v1034_v56 = vmax.f32 %v1032_v15, %v2460_v3  ;;  %v1060_v15 = vmax.f32 %v1058_v4, %v2499_v53 }
 0x2d8   : > { %v1062_v5 = vmax.f32 %v1060_v15, %v2388_v23 }
 0x2da   : > { %v1064_v40 = vmax.f32 %v1062_v5, %v2404_v31 }
 0x2dd   : > { %v2470_v18 = vpop.f32.mrf.mxu2  ;;  %v2501_v0 = vpop.f32.mrf.mxu3 }
 0x2de   : > { %v1035_v9 = vmax.f32 %v1033_v22, %v2470_v18 }
 0x2e5   : > { %v2488_v29 = vpop.f32.mrf.mxu2  ;;  %v2523_v24 = vpop.f32.mrf.mxu3 }
 0x2e6   : > { %v1036_v58 = vmax.f32 %v1034_v56, %v2488_v29 }
 0x2ed   : > { %v2511_v20 = vpop.f32.mrf.mxu2 }
 0x2ee   : > { %v1037_v7 = vmax.f32 %v1035_v9, %v2511_v20  ;;  %v1061_v9 = vmax.f32 %v1059_v25, %v2521_v36 }
 0x2f0   : > { %v1038_v28 = vmax.f32 %v1036_v58, %v1037_v7  ;;  %v1063_v58 = vmax.f32 %v1061_v9, %v2396_v27  ;;  %v1066_v7 = vmax.f32 %v1064_v40, %v2420_v39 }
 0x2f2   : > { %v1039_v22 = vrot.slane %v1038_v28, 4  ;;  %v1065_v4 = vmax.f32 %v1063_v58, %v2412_v35  ;;  %v1068_v53 = vmax.f32 %v1066_v7, %v2436_v47 }
 0x2f4   : > { %v1040_v56 = vmax.f32 %v1038_v28, %v1039_v22  ;;  %v1067_v55 = vmax.f32 %v1065_v4, %v2428_v43  ;;  %v1070_v15 = vmax.f32 %v1068_v53, %v2458_v2  ;;  %v2535_v28 = vpop.f32.mrf.mxu3 }
 0x2f6   : > { %v1041_v19 = vrot.slane %v1040_v56, 2  ;;  %v1069_v22 = vmax.f32 %v1067_v55, %v2444_v51  ;;  %v1072_v25 = vmax.f32 %v1070_v15, %v2501_v0 }
 0x2f8   : > { %v1042_v12 = vmax.f32 %v1040_v56, %v1041_v19  ;;  %v1071_v9 = vmax.f32 %v1069_v22, %v2478_v6  ;;  %v1074_v56 = vmax.f32 %v1072_v25, %v2535_v28 }
 0x2fa   : > { %v1043_v41 = vrot.slane %v1042_v12, 1  ;;  %v1073_v40 = vmax.f32 %v1071_v9, %v2523_v24  ;;  %v2967_v9 = vld [vmem:[#allocation23_spill] sm:$0xff] }
 0x2fc   : > { %v2539_v5 = vmax.f32 %v1042_v12, %v1043_v41  ;;  %v1075_v7 = vmax.f32 %v1073_v40, %v1074_v56 }
 0x2fe   : > { %v1082_v19 = vsub.f32 %v2322_v54, %v2539_v5  ;;  %v1084_v53 = vsub.f32 %v2326_v57, %v2539_v5  ;;  %v1086_v58 = vsub.f32 %v2332_v59, %v2539_v5  ;;  %v1088_v41 = vsub.f32 %v2338_v62, %v2539_v5  ;;  %v2966_v54 = vld [vmem:[#allocation21_spill] sm:$0xff] }
 0x2ff   : > { %v1090_v55 = vsub.f32 %v2344_v1, %v2539_v5  ;;  %v1076_v22 = vrot.slane %v1075_v7, 4  ;;  %v1092_v25 = vsub.f32 %v2966_v54, %v2539_v5  ;;  %v1094_v59 = vsub.f32 %v2967_v9, %v2539_v5  ;;  %v2968_v9 = vld [vmem:[#allocation30_spill] sm:$0xff] }
 0x300   : > { %v1146_v12 = vmul.f32 1.442695, %v1082_v19  ;;  %v1150_v4 = vmul.f32 1.442695, %v1084_v53  ;;  %v1154_v15 = vmul.f32 1.442695, %v1086_v58  ;;  %v1096_v62 = vsub.f32 %v2364_v11, %v2539_v5 }
 0x301   : > { %v1158_v57 = vmul.f32 1.442695, %v1088_v41  ;;  %v1162_v56 = vmul.f32 1.442695, %v1090_v55  ;;  %v1077_v40 = vmax.f32 %v1075_v7, %v1076_v22  ;;  %v1166_v19 = vmul.f32 1.442695, %v1092_v25 }
 0x302   : > { %1791 = vpow2.f32 %v1146_v12  ;;  %v1098_v53 = vsub.f32 %v2370_v14, %v2539_v5  ;;  %v1112_v41 = vsub.f32 %v2426_v42, %v2539_v5  ;;  %v1170_v12 = vmul.f32 1.442695, %v1094_v59 }
 0x303   : > { %1793 = vpow2.f32 %v1150_v4  ;;  %v1100_v7 = vsub.f32 %v2376_v17, %v2539_v5  ;;  %v1078_v4 = vrot.slane %v1077_v40, 2  ;;  %v1174_v14 = vmul.f32 1.442695, %v1096_v62 }
 0x304   : > { %1795 = vpow2.f32 %v1154_v15  ;;  %v1110_v15 = vsub.f32 %v2416_v37, %v2539_v5  ;;  %v1102_v22 = vsub.f32 %v2384_v21, %v2539_v5  ;;  %v1178_v42 = vmul.f32 1.442695, %v1098_v53  ;;  %v2969_v21 = vld [vmem:[#allocation32_spill] sm:$0xff] }
 0x305   : > { %1797 = vpow2.f32 %v1158_v57  ;;  %v1108_v17 = vsub.f32 %v2408_v33, %v2539_v5  ;;  %v1206_v57 = vmul.f32 1.442695, %v1112_v41  ;;  %v1104_v59 = vsub.f32 %v2968_v9, %v2539_v5 }
 0x306   : > { %1799 = vpow2.f32 %v1162_v56  ;;  %v1182_v56 = vmul.f32 1.442695, %v1100_v7  ;;  %v1079_v62 = vmax.f32 %v1077_v40, %v1078_v4  ;;  %v1106_v53 = vsub.f32 %v2969_v21, %v2539_v5 }
 0x307   : > { %1801 = vpow2.f32 %v1166_v19  ;;  %v1114_v43 = vsub.f32 %v2434_v46, %v2539_v5  ;;  %v1186_v33 = vmul.f32 1.442695, %v1102_v22  ;;  %v1116_v7 = vsub.f32 %v2442_v50, %v2539_v5  ;;  %v2970_v22 = vld [vmem:[#allocation37_spill] sm:$0xff] }
 0x308   : > { %v2560_v1 = vpop.eup %1791  ;;  %1803 = vpow2.f32 %v1170_v12  ;;  %v1118_v40 = vsub.f32 %v2456_v63, %v2539_v5  ;;  %v1198_v4 = vmul.f32 1.442695, %v1108_v17  ;;  %v1194_v9 = vmul.f32 1.442695, %v1106_v53 }
 0x309   : > { %v2564_v58 = vpop.eup %1793  ;;  %1805 = vpow2.f32 %v1174_v14  ;;  %v1190_v14 = vmul.f32 1.442695, %v1104_v59  ;;  %v1122_v50 = vsub.f32 %v2394_v26, %v2539_v5  ;;  %v1126_v59 = vsub.f32 %v2410_v34, %v2539_v5 }
 0x30a   : > { %v1274_v11 = vadd.f32 %v2564_v58, %v2560_v1  ;;  %v2572_v55 = vpop.eup %1795  ;;  %1807 = vpow2.f32 %v1178_v42  ;;  %v1120_v42 = vsub.f32 %v2970_v22, %v2539_v5  ;;  %v1218_v53 = vmul.f32 1.442695, %v1118_v40 }
 0x30b   : > { %v2579_v25 = vpop.eup %1797  ;;  %1809 = vpow2.f32 %v1206_v57  ;;  %v1124_v57 = vsub.f32 %v2402_v30, %v2539_v5  ;;  %v1142_v34 = vsub.f32 %v2488_v29, %v2539_v5 }
 0x30c   : > { %v1275_v54 = vadd.f32 %v2572_v55, %v1274_v11  ;;  %v2586_v19 = vpop.eup %1799  ;;  %v1202_v11 = vmul.f32 1.442695, %v1110_v15  ;;  %1811 = vpow2.f32 %v1182_v56  ;;  %v1214_v56 = vmul.f32 1.442695, %v1116_v7 }
 0x30d   : > { %v2593_v12 = vpop.eup %1801  ;;  %v1222_v30 = vmul.f32 1.442695, %v1120_v42  ;;  %v1226_v7 = vmul.f32 1.442695, %v1122_v50 }
 0x30e   : > { %v1276_v37 = vadd.f32 %v2579_v25, %v1275_v54  ;;  %v1080_v54 = vrot.slane %v1079_v62, 1  ;;  %v2600_v46 = vpop.eup %1803  ;;  %1813 = vpow2.f32 %v1202_v11 }
 0x30f   : > { %1815 = vpow2.f32 %v1186_v33  ;;  %v2607_v17 = vpop.eup %1805  ;;  %v1128_v33 = vsub.f32 %v2418_v38, %v2539_v5 }
 0x310   : > { %v1277_v41 = vadd.f32 %v2586_v19, %v1276_v37  ;;  %v1210_v37 = vmul.f32 1.442695, %v1114_v43  ;;  %1817 = vpow2.f32 %v1198_v4  ;;  %v2613_v21 = vpop.eup %1807  ;;  %v2616_v11 = vmax.f32 %v1079_v62, %v1080_v54 }
 0x311   : > { %1819 = vpow2.f32 %v1190_v14  ;;  %v2618_v43 = vpop.eup %1809  ;;  %v1144_v4 = vsub.f32 %v2511_v20, %v2539_v5  ;;  %v1230_v14 = vmul.f32 1.442695, %v1124_v57  ;;  %v1238_v42 = vmul.f32 1.442695, %v1128_v33 }
 0x312   : > { %v1278_v15 = vadd.f32 %v2593_v12, %v1277_v41  ;;  %1821 = vpow2.f32 %v1194_v9  ;;  %v2622_v41 = vpop.eup %1811  ;;  %1352 = vmatpush.msrb.mxu2 %v2618_v43  ;;  %v1083_v29 = vsub.f32 %v2336_v61, %v2616_v11  ;;  %v2971_v9 = vld [vmem:[#allocation19_spill] sm:$0xff]  ;;  %v1140_v20 = vsub.f32 %v2470_v18, %v2539_v5  ;;  %v2972_v61 = vld [vmem:[#allocation20_spill] sm:$0xff] }
 0x313   : > { %1823 = vpow2.f32 %v1210_v37  ;;  %v1085_v50 = vsub.f32 %v2971_v9, %v2616_v11  ;;  %v1138_v33 = vsub.f32 %v2460_v3, %v2539_v5 }
 0x314   : > { %v1279_v63 = vadd.f32 %v2600_v46, %v1278_v15  ;;  %v1814_v62 = vpop.eup %1813  ;;  %1825 = vpow2.f32 %v1214_v56  ;;  %v1234_v15 = vmul.f32 1.442695, %v1126_v59  ;;  %v1270_v56 = vmul.f32 1.442695, %v1144_v4 }
 0x315   : > { %v1816_v38 = vpop.eup %1815  ;;  %1827 = vpow2.f32 %v1218_v53  ;;  %1353 = vmatpush.msrb.mxu2 %v1814_v62  ;;  %v1087_v53 = vsub.f32 %v2972_v61, %v2616_v11  ;;  %v1262_v9 = vmul.f32 1.442695, %v1140_v20 }
 0x316   : > { %v1280_v26 = vadd.f32 %v2607_v17, %v1279_v63  ;;  %v1818_v22 = vpop.eup %1817  ;;  %1829 = vpow2.f32 %v1222_v30  ;;  %v1266_v63 = vmul.f32 1.442695, %v1142_v34  ;;  %v2973_v34 = vld [vmem:[#allocation22_spill] sm:$0xff] }
 0x317   : > { %v1820_v37 = vpop.eup %1819  ;;  %1831 = vpow2.f32 %v1226_v7  ;;  %1354 = vmatpush.msrb.mxu2 %v1818_v22  ;;  %v1089_v7 = vsub.f32 %v2973_v34, %v2616_v11 }
 0x318   : > { %v1281_v40 = vadd.f32 %v2613_v21, %v1280_v26  ;;  %v1822_v59 = vpop.eup %1821  ;;  %1833 = vpow2.f32 %v1230_v14  ;;  %v1152_v14 = vmul.f32 1.442695, %v1085_v50  ;;  %v1134_v50 = vsub.f32 %v2438_v48, %v2539_v5 }
 0x319   : > { %v2639_v26 = vpop.eup %1823  ;;  %1835 = vpow2.f32 %v1234_v15  ;;  %1355 = vmatpush.msrb.mxu2 %v1822_v59  ;;  %v1091_v15 = vsub.f32 %v2362_v10, %v2616_v11  ;;  %v1160_v20 = vmul.f32 1.442695, %v1089_v7  ;;  %v1132_v10 = vsub.f32 %v2430_v44, %v2539_v5 }
 0x31a   : > { %v1282_v54 = vadd.f32 %v2622_v41, %v1281_v40  ;;  %v1148_v40 = vmul.f32 1.442695, %v1083_v29  ;;  %v2643_v18 = vpop.eup %1825  ;;  %1837 = vpow2.f32 %v1238_v42  ;;  %v1156_v29 = vmul.f32 1.442695, %v1087_v53 }
 0x31b   : > { %v2647_v4 = vpop.eup %1827  ;;  %1839 = vpow2.f32 %v1266_v63  ;;  %1356 = vmatpush.msrb.mxu2 %v1820_v37  ;;  %v1164_v53 = vmul.f32 1.442695, %v1091_v15 }
 0x31c   : > { %v1283_v57 = vadd.f32 %v1816_v38, %v1282_v54  ;;  %v1136_v54 = vsub.f32 %v2446_v52, %v2539_v5  ;;  %v2651_v3 = vpop.eup %1829  ;;  %1841 = vpow2.f32 %v1270_v56 }
 0x31d   : > { %v2655_v42 = vpop.eup %1831  ;;  %1843 = vpow2.f32 %v1148_v40  ;;  %1357 = vmatpush.msrb.mxu2 %v1816_v38  ;;  %v2974_v38 = vld [vmem:[#allocation34_spill] sm:$0xff] }
 0x31e   : > { %v1284_v30 = vadd.f32 %v1820_v37, %v1283_v57  ;;  %v1258_v57 = vmul.f32 1.442695, %v1138_v33  ;;  %v2659_v52 = vpop.eup %1833  ;;  %v1093_v37 = vsub.f32 %v2368_v13, %v2616_v11  ;;  %1845 = vpow2.f32 %v1152_v14 }
 0x31f   : > { %v2663_v63 = vpop.eup %1835  ;;  %1847 = vpow2.f32 %v1262_v9  ;;  %1358 = vmatpush.msrb.mxu2 %v2622_v41  ;;  %v1095_v13 = vsub.f32 %v2374_v16, %v2616_v11  ;;  %v2975_v41 = vld [vmem:[#allocation27_spill] sm:$0xff]  ;;  %v1246_v16 = vmul.f32 1.442695, %v1132_v10 }
 0x320   : > { %v1285_v61 = vadd.f32 %v1822_v59, %v1284_v30  ;;  %v1254_v59 = vmul.f32 1.442695, %v1136_v54  ;;  %v2668_v48 = vpop.eup %1837  ;;  %1849 = vpow2.f32 %v1156_v29  ;;  %v1250_v30 = vmul.f32 1.442695, %v1134_v50  ;;  %v2976_v54 = vld [vmem:[#allocation29_spill] sm:$0xff] }
 0x321   : > { %v2674_v33 = vpop.eup %1839  ;;  %1851 = vpow2.f32 %v1258_v57  ;;  %1359 = vmatpush.msrb.mxu2 %v2613_v21  ;;  %v1097_v40 = vsub.f32 %v2975_v41, %v2616_v11  ;;  %v1099_v9 = vsub.f32 %v2976_v54, %v2616_v11  ;;  %v1172_v15 = vmul.f32 1.442695, %v1095_v13  ;;  %v2977_v57 = vld [vmem:[#allocation31_spill] sm:$0xff]  ;;  %v2730_v54 = vpop.permute.xlu2 %488 }
 0x322   : > { %v1286_v34 = vadd.f32 %v1818_v22, %v1285_v61  ;;  %v1130_v22 = vsub.f32 %v2974_v38, %v2539_v5  ;;  %1853 = vpow2.f32 %v1160_v20  ;;  %v1168_v5 = vmul.f32 1.442695, %v1093_v37 }
 0x323   : > { %1855 = vpow2.f32 %v1254_v59  ;;  %1360 = vmatpush.msrb.mxu2 %v2607_v17  ;;  %v1113_v61 = vsub.f32 %v2454_v60, %v2616_v11  ;;  %v1103_v60 = vsub.f32 %v2406_v32, %v2616_v11  ;;  %v1111_v20 = vsub.f32 %v2440_v49, %v2616_v11  ;;  %v2978_v32 = vld [vmem:[#allocation33_spill] sm:$0xff] }
 0x324   : > { %v1287_v56 = vadd.f32 %v1814_v62, %v1286_v34  ;;  %v2678_v62 = vpop.eup %1841  ;;  %1857 = vpow2.f32 %v1164_v53  ;;  %v1101_v34 = vsub.f32 %v2977_v57, %v2616_v11  ;;  %v1176_v10 = vmul.f32 1.442695, %v1097_v40 }
 0x325   : > { %v2682_v7 = vpop.eup %1843  ;;  %1375 = vmatpush.msra.mxu3 %v2678_v62  ;;  %1859 = vpow2.f32 %v1250_v30  ;;  %1361 = vmatpush.msrb.mxu2 %v2600_v46  ;;  %v1180_v38 = vmul.f32 1.442695, %v1099_v9  ;;  %v1105_v13 = vsub.f32 %v2978_v32, %v2616_v11  ;;  %v1109_v49 = vsub.f32 %v2432_v45, %v2616_v11 }
 0x326   : > { %v1288_v44 = vadd.f32 %v2618_v43, %v1287_v56  ;;  %v2689_v21 = vpop.eup %1845  ;;  %v1242_v43 = vmul.f32 1.442695, %v1130_v22  ;;  %1861 = vpow2.f32 %v1168_v5  ;;  %v1208_v53 = vmul.f32 1.442695, %v1113_v61  ;;  %v2979_v5 = vld [vmem:[#allocation35_spill] sm:$0xff] }
 0x327   : > { %v2693_v29 = vpop.eup %1847  ;;  %v1311_v37 = vadd.f32 %v2689_v21, %v2682_v7  ;;  %1376 = vmatpush.msra.mxu3 %v2674_v33  ;;  %1863 = vpow2.f32 %v1246_v16  ;;  %1362 = vmatpush.msrb.mxu2 %v2593_v12  ;;  %v1184_v41 = vmul.f32 1.442695, %v1101_v34  ;;  %v1107_v16 = vsub.f32 %v2979_v5, %v2616_v11 }
 0x328   : > { %v1289_v14 = vadd.f32 %v2639_v26, %v1288_v44  ;;  %v2702_v17 = vpop.eup %1849  ;;  %1865 = vpow2.f32 %v1172_v15  ;;  %v1204_v45 = vmul.f32 1.442695, %v1111_v20  ;;  %v1200_v15 = vmul.f32 1.442695, %v1109_v49 }
 0x329   : > { %v2708_v59 = vpop.eup %1851  ;;  %v1312_v22 = vadd.f32 %v2702_v17, %v1311_v37  ;;  %1377 = vmatpush.msra.mxu3 %v2693_v29  ;;  %1867 = vpow2.f32 %v1242_v43  ;;  %1363 = vmatpush.msrb.mxu2 %v2586_v19  ;;  %v1188_v43 = vmul.f32 1.442695, %v1103_v60  ;;  %v1192_v34 = vmul.f32 1.442695, %v1105_v13 }
 0x32a   : > { %v1290_v50 = vadd.f32 %v2643_v18, %v1289_v14  ;;  %v2714_v46 = vpop.eup %1853  ;;  %1869 = vpow2.f32 %v1176_v10  ;;  %v1196_v20 = vmul.f32 1.442695, %v1107_v16 }
 0x32b   : > { %v2720_v30 = vpop.eup %1855  ;;  %v1313_v40 = vadd.f32 %v2714_v46, %v1312_v22  ;;  %1378 = vmatpush.msra.mxu3 %v2708_v59  ;;  %1871 = vpow2.f32 %v1180_v38  ;;  %1364 = vmatpush.msrb.mxu2 %v2579_v25  ;;  %v2980_v22 = vld [vmem:[#allocation25_spill] sm:$0xff] }
 0x32c   : > { %v1291_v56 = vadd.f32 %v2647_v4, %v1290_v50  ;;  %v2726_v12 = vpop.eup %1857  ;;  %1873 = vpow2.f32 %v1208_v53  ;;  %v2750_v32 = vadd.f32 %v2980_v22, %v2730_v54 }
 0x32d   : > { %v1860_v14 = vpop.eup %1859  ;;  %v1314_v61 = vadd.f32 %v2726_v12, %v1313_v40  ;;  %1379 = vmatpush.msra.mxu3 %v2720_v30  ;;  %1875 = vpow2.f32 %v1184_v41  ;;  %1365 = vmatpush.msrb.mxu2 %v2572_v55  ;;  %v1115_v41 = vsub.f32 %v2474_v8, %v2616_v11 }
 0x32e   : > { %v1292_v44 = vadd.f32 %v2651_v3, %v1291_v56  ;;  %v2736_v19 = vpop.eup %1861  ;;  %1877 = vpow2.f32 %v1204_v45  ;;  %v2769_v45 = vpop.permute.xlu2 %493 }
 0x32f   : > { %v1864_v50 = vpop.eup %1863  ;;  %v1315_v37 = vadd.f32 %v2736_v19, %v1314_v61  ;;  %1380 = vmatpush.msra.mxu3 %v1860_v14  ;;  %1879 = vpow2.f32 %v1188_v43  ;;  %1366 = vmatpush.msrb.mxu2 %v2564_v58  ;;  %v2981_v43 = vld [vmem:[#allocation38_spill] sm:$0xff] }
 0x330   : > { %v1293_v9 = vadd.f32 %v2655_v42, %v1292_v44  ;;  %v2741_v60 = vpop.eup %1865  ;;  %1881 = vpow2.f32 %v1200_v15  ;;  %v1117_v61 = vsub.f32 %v2981_v43, %v2616_v11 }
 0x331   : > { %v1868_v10 = vpop.eup %1867  ;;  %v1316_v56 = vadd.f32 %v2741_v60, %v1315_v37  ;;  %1381 = vmatpush.msra.mxu3 %v1864_v50  ;;  %1883 = vpow2.f32 %v1192_v34  ;;  %1367 = vmatpush.msrb.mxu2 %v2560_v1  ;;  %v1145_v1 = vsub.f32 %v2535_v28, %v2616_v11  ;;  %v1119_v28 = vsub.f32 %v2521_v36, %v2616_v11 }
 0x332   : > { %v1294_v57 = vadd.f32 %v2659_v52, %v1293_v9  ;;  %v2746_v38 = vpop.eup %1869  ;;  %1885 = vpow2.f32 %v1196_v20  ;;  %1368 = vmatmul.f32.vlgmr.msrb.gmra.mxu2 %v2750_v32  ;;  %v1212_v37 = vmul.f32 1.442695, %v1115_v41  ;;  %v1216_v36 = vmul.f32 1.442695, %v1117_v61 }
 0x333   : > { %v2752_v55 = vpop.eup %1871  ;;  %v1317_v49 = vadd.f32 %v2746_v38, %v1316_v56  ;;  %1382 = vmatpush.msra.mxu3 %v1868_v10  ;;  %v1272_v56 = vmul.f32 1.442695, %v1145_v1 }
 0x334   : > { %v1295_v25 = vadd.f32 %v2663_v63, %v1294_v57  ;;  %v2757_v53 = vpop.eup %1873  ;;  %1887 = vpow2.f32 %v1212_v37  ;;  %v2985_v37 = vld [vmem:[#allocation26_spill] sm:$0xff] }
 0x335   : > { %v2760_v58 = vpop.eup %1875  ;;  %v1318_v40 = vadd.f32 %v2752_v55, %v1317_v49  ;;  %1383 = vmatpush.msra.mxu3 %v2668_v48  ;;  %1398 = vmatpush.msra.mxu2 %v2757_v53  ;;  %v1123_v49 = vsub.f32 %v2396_v27, %v2616_v11  ;;  %v1137_v27 = vsub.f32 %v2458_v2, %v2616_v11  ;;  %1889 = vpow2.f32 %v1272_v56 }
 0x336   : > { %v1296_v13 = vadd.f32 %v2668_v48, %v1295_v25  ;;  %v1878_v5 = vpop.eup %1877  ;;  %v1143_v48 = vsub.f32 %v2523_v24, %v2616_v11  ;;  %1891 = vpow2.f32 %v1216_v36 }
 0x337   : > { %v1880_v16 = vpop.eup %1879  ;;  %v1319_v15 = vadd.f32 %v2760_v58, %v1318_v40  ;;  %1384 = vmatpush.msra.mxu3 %v2663_v63  ;;  %1399 = vmatpush.msra.mxu2 %v1878_v5  ;;  %v1141_v63 = vsub.f32 %v2501_v0, %v2616_v11  ;;  %v1139_v0 = vsub.f32 %v2478_v6, %v2616_v11 }
 0x338   : > { %v1297_v44 = vadd.f32 %v1868_v10, %v1296_v13  ;;  %v1882_v8 = vpop.eup %1881  ;;  %v2982_v10 = vld [vmem:[#allocation28_spill] sm:$0xff] }
 0x339   : > { %v1884_v57 = vpop.eup %1883  ;;  %v1320_v20 = vadd.f32 %v1880_v16, %v1319_v15  ;;  %1385 = vmatpush.msra.mxu3 %v2659_v52  ;;  %1400 = vmatpush.msra.mxu2 %v1882_v8  ;;  %v2782_v25 = vadd.f32 %v2982_v10, %v2769_v45  ;;  %v2983_v52 = vld [vmem:[#allocation24_spill] sm:$0xff] }
 0x33a   : > { %v1298_v9 = vadd.f32 %v1864_v50, %v1297_v44  ;;  %v1886_v50 = vpop.eup %1885  ;;  %v2792_v13 = vadd.f32 %v2983_v52, %v2730_v54  ;;  %v1268_v44 = vmul.f32 1.442695, %v1143_v48  ;;  %v1264_v54 = vmul.f32 1.442695, %v1141_v63 }
 0x33b   : > { %v1321_v22 = vadd.f32 %v1884_v57, %v1320_v20  ;;  %1386 = vmatpush.msra.mxu3 %v2655_v42  ;;  %1401 = vmatpush.msra.mxu2 %v1886_v50  ;;  %v1125_v42 = vsub.f32 %v2404_v31, %v2616_v11  ;;  %v1260_v31 = vmul.f32 1.442695, %v1139_v0  ;;  %v546_v20 = vadd.f32 %v2985_v37, %v2769_v45 }
 0x33c   : > { %v1299_v34 = vadd.f32 %v1860_v14, %v1298_v9  ;;  %v1121_v14 = vsub.f32 %v2388_v23, %v2616_v11  ;;  %1371 = vmatmul.f32.gmra.mxu2 %v2782_v25  ;;  %1893 = vpow2.f32 %v1268_v44  ;;  %v1228_v9 = vmul.f32 1.442695, %v1123_v49 }
 0x33d   : > { %v1322_v41 = vadd.f32 %v1886_v50, %v1321_v22  ;;  %1387 = vmatpush.msra.mxu3 %v2651_v3  ;;  %1402 = vmatpush.msra.mxu2 %v1884_v57  ;;  %v1127_v3 = vsub.f32 %v2412_v35, %v2616_v11  ;;  %v1133_v35 = vsub.f32 %v2436_v47, %v2616_v11 }
 0x33e   : > { %v1300_v24 = vadd.f32 %v2720_v30, %v1299_v34  ;;  %v1220_v30 = vmul.f32 1.442695, %v1119_v28  ;;  %v1224_v40 = vmul.f32 1.442695, %v1121_v14 }
 0x33f   : > { %v1323_v1 = vadd.f32 %v1882_v8, %v1322_v41  ;;  %1388 = vmatpush.msra.mxu3 %v2647_v4  ;;  %1403 = vmatpush.msra.mxu2 %v1880_v16  ;;  %v1129_v4 = vsub.f32 %v2420_v39, %v2616_v11  ;;  %v2984_v39 = vld [vmem:[#allocation36_spill] sm:$0xff] }
 0x340   : > { %v1301_v23 = vadd.f32 %v2708_v59, %v1300_v24  ;;  %v1135_v59 = vsub.f32 %v2444_v51, %v2616_v11  ;;  %1895 = vpow2.f32 %v1220_v30  ;;  %v2818_v51 = vpop.eup %1887  ;;  %v1131_v47 = vsub.f32 %v2984_v39, %v2616_v11 }
 0x341   : > { %v1324_v43 = vadd.f32 %v1878_v5, %v1323_v1  ;;  %1389 = vmatpush.msra.mxu3 %v2643_v18  ;;  %1404 = vmatpush.msra.mxu2 %v2760_v58  ;;  %1897 = vpow2.f32 %v1264_v54  ;;  %v2826_v18 = vpop.eup %1889  ;;  %v1240_v11 = vmul.f32 1.442695, %v1129_v4  ;;  %v1477_v39 = vstv %s1472_s24 }
 0x342   : > { %v1302_v6 = vadd.f32 %v2693_v29, %v1301_v23  ;;  %v1256_v29 = vmul.f32 1.442695, %v1137_v27  ;;  %1899 = vpow2.f32 %v1224_v40  ;;  %v1252_v58 = vmul.f32 1.442695, %v1135_v59  ;;  %v2831_v61 = vpop.eup %1891 }
 0x343   : > { %v1325_v5 = vadd.f32 %v2757_v53, %v1324_v43  ;;  %1390 = vmatpush.msra.mxu3 %v2639_v26  ;;  %1405 = vmatpush.msra.mxu2 %v2752_v55  ;;  %1901 = vpow2.f32 %v1260_v31  ;;  %v1894_v26 = vpop.eup %1893  ;;  %v1248_v55 = vmul.f32 1.442695, %v1133_v35  ;;  %v1244_v57 = vmul.f32 1.442695, %v1131_v47 }
 0x344   : > { %v1303_v2 = vadd.f32 %v2674_v33, %v1302_v6  ;;  %v1232_v33 = vmul.f32 1.442695, %v1125_v42  ;;  %1391 = vmatmul.f32.vlgmr.msra.gmra.mxu3 %v2792_v13  ;;  %1903 = vpow2.f32 %v1228_v9 }
 0x345   : > { %v1326_v15 = vadd.f32 %v2818_v51, %v1325_v5  ;;  %1421 = vmatpush.msrb.mxu3 %v2826_v18  ;;  %1406 = vmatpush.msra.mxu2 %v2746_v38  ;;  %1905 = vpow2.f32 %v1256_v29 }
 0x346   : > { %v2821_v16 = vadd.f32 %v2678_v62, %v1303_v2  ;;  %v1236_v62 = vmul.f32 1.442695, %v1127_v3  ;;  %v1896_v53 = vpop.eup %1895  ;;  %1907 = vpow2.f32 %v1232_v33 }
 0x347   : > { %v1327_v8 = vadd.f32 %v2831_v61, %v1326_v15  ;;  %1422 = vmatpush.msrb.mxu3 %v1894_v26  ;;  %1407 = vmatpush.msra.mxu2 %v2741_v60  ;;  %v1898_v48 = vpop.eup %1897  ;;  %1909 = vpow2.f32 %v1252_v58 }
 0x348   : > { %v1900_v34 = vpop.eup %1899  ;;  %1911 = vpow2.f32 %v1236_v62  ;;  %v1923_v62 = vld [vmem:[%s2236_s13] sm:$0xff] }
 0x349   : > { %v1328_v28 = vadd.f32 %v1896_v53, %v1327_v8  ;;  %1423 = vmatpush.msrb.mxu3 %v1898_v48  ;;  %1408 = vmatpush.msra.mxu2 %v2736_v19  ;;  %v1902_v38 = vpop.eup %1901  ;;  %1913 = vpow2.f32 %v1248_v55 }
 0x34a   : > { %v1904_v50 = vpop.eup %1903  ;;  %1915 = vpow2.f32 %v1240_v11 }
 0x34b   : > { %v1329_v10 = vadd.f32 %v1900_v34, %v1328_v28  ;;  %1424 = vmatpush.msrb.mxu3 %v1902_v38  ;;  %1409 = vmatpush.msra.mxu2 %v2726_v12  ;;  %v1906_v60 = vpop.eup %1905  ;;  %1917 = vpow2.f32 %v1244_v57 }
 0x34c   : > { %1394 = vmatmul.f32.gmra.mxu3 %v546_v20  ;;  %v1908_v63 = vpop.eup %1907 }
 0x34d   : > { %v1330_v56 = vadd.f32 %v1904_v50, %v1329_v10  ;;  %1425 = vmatpush.msrb.mxu3 %v1906_v60  ;;  %1410 = vmatpush.msra.mxu2 %v2714_v46  ;;  %v1910_v19 = vpop.eup %1909 }
 0x34e   : > { %v1912_v24 = vpop.eup %1911 }
 0x34f   : > { %v1331_v14 = vadd.f32 %v1908_v63, %v1330_v56  ;;  %1426 = vmatpush.msrb.mxu3 %v1910_v19  ;;  %1411 = vmatpush.msra.mxu2 %v2702_v17  ;;  %v1914_v45 = vpop.eup %1913 }
 0x350   : > { %v1916_v36 = vpop.eup %1915 }
 0x351   : > { %v1332_v22 = vadd.f32 %v1912_v24, %v1331_v14  ;;  %1427 = vmatpush.msrb.mxu3 %v1914_v45  ;;  %1412 = vmatpush.msra.mxu2 %v2689_v21  ;;  %v1918_v12 = vpop.eup %1917 }
 0x353   : > { %v1333_v52 = vadd.f32 %v1916_v36, %v1332_v22  ;;  %1428 = vmatpush.msrb.mxu3 %v1918_v12  ;;  %1413 = vmatpush.msra.mxu2 %v2682_v7  ;;  %v1925_v22 = vld [vmem:[%s2236_s13 + $0x8] sm:$0xff] }
 0x354   : > { %1414 = vmatmul.f32.vlgmr.msra.gmra.mxu2 %v2750_v32  ;;  %v1305_v32 = vrot.slane %v2821_v16, 4 }
 0x355   : > { %v1334_v46 = vadd.f32 %v1918_v12, %v1333_v52  ;;  %1429 = vmatpush.msrb.mxu3 %v1916_v36 }
 0x356   : > { %v1306_v30 = vadd.f32 %v1305_v32, %v2821_v16 }
 0x357   : > { %v1335_v49 = vadd.f32 %v1914_v45, %v1334_v46  ;;  %1430 = vmatpush.msrb.mxu3 %v1912_v24 }
 0x358   : > { %v1307_v41 = vrot.slane %v1306_v30, 2 }
 0x359   : > { %v1336_v0 = vadd.f32 %v1910_v19, %v1335_v49  ;;  %1431 = vmatpush.msrb.mxu3 %v1908_v63 }
 0x35b   : > { %v1337_v17 = vadd.f32 %v1906_v60, %v1336_v0  ;;  %1432 = vmatpush.msrb.mxu3 %v1904_v50 }
 0x35c   : > { %1417 = vmatmul.f32.gmra.mxu2 %v2782_v25  ;;  %v1308_v25 = vadd.f32 %v1307_v41, %v1306_v30 }
 0x35d   : > { %v1338_v44 = vadd.f32 %v1902_v38, %v1337_v17  ;;  %1433 = vmatpush.msrb.mxu3 %v1900_v34  ;;  %v1926_v17 = vld [vmem:[%s2236_s13 + $0x18] sm:$0xff] }
 0x35e   : > { %v1309_v42 = vrot.slane %v1308_v25, 1 }
 0x35f   : > { %v1339_v21 = vadd.f32 %v1898_v48, %v1338_v44  ;;  %1434 = vmatpush.msrb.mxu3 %v1896_v53  ;;  %v1924_v48 = vld [vmem:[%s2236_s13 + $0x10] sm:$0xff] }
 0x360   : > { %v1310_v27 = vadd.f32 %v1309_v42, %v1308_v25 }
 0x361   : > { %v1340_v23 = vadd.f32 %v1894_v26, %v1339_v21  ;;  %1435 = vmatpush.msrb.mxu3 %v2831_v61 }
 0x362   : > { %1919 = vrcp.f32 %v1310_v27  ;;  %v1455_v43 = vand.u32 2147483648, %v1310_v27  ;;  %vm1449_vm4 = vweird.f32 %v1310_v27  ;;  %v1453_v4 = vand.u32 2147483647, %v1310_v27 }
 0x363   : > { %v1341_v7 = vadd.f32 %v2826_v18, %v1340_v23  ;;  %1436 = vmatpush.msrb.mxu3 %v2818_v51 }
 0x364   : > { %1437 = vmatmul.f32.vlgmr.msrb.gmra.mxu3 %v2792_v13  ;;  %v1456_v16 = vor.u32 1.1754944e-38, %v1455_v43  ;;  %vm1454_vm6 = vcmp.eq.f32.partialorder %v1453_v4, 8.507059e+37 }
 0x365   : > { %v1342_v6 = vrot.slane %v1341_v7, 4 }
 0x367   : > { %v1343_v1 = vadd.f32 %v1342_v6, %v1341_v7 }
 0x368   : > { %v1920_v54 = vpop.eup %1919 }
 0x369   : > { %v1445_v40 = vmul.f32 %v1920_v54, %v1310_v27  ;;  %v1344_v59 = vrot.slane %v1343_v1, 2  ;;  %vm1450_vm3 = vweird.f32 %v1920_v54 }
 0x36a   : > { %vm1451_vm5 = vmor %vm1449_vm4, %vm1450_vm3 }
 0x36b   : > { %v1446_v3 = vsub.f32 1.0, %v1445_v40  ;;  %v1345_v2 = vadd.f32 %v1344_v59, %v1343_v1 }
 0x36c   : > { %1440 = vmatmul.f32.gmra.mxu3 %v546_v20 }
 0x36d   : > { %v1447_v31 = vmul.f32 %v1920_v54, %v1446_v3  ;;  %v1346_v35 = vrot.slane %v1345_v2, 1 }
 0x36f   : > { %v1448_v13 = vadd.f32 %v1920_v54, %v1447_v31  ;;  %v1347_v5 = vadd.f32 %v1346_v35, %v1345_v2 }
 0x371   : > { %v1452_v29 = vsel %vm1451_vm5, %v1920_v54, %v1448_v13  ;;  %1921 = vrcp.f32 %v1347_v5  ;;  %v1469_v50 = vand.u32 2147483648, %v1347_v5  ;;  %vm1463_vm8 = vweird.f32 %v1347_v5 }
 0x372   : > { %v1457_v18 = vsel %vm1454_vm6, %v1456_v16, %v1452_v29  ;;  %v1467_v10 = vand.u32 2147483647, %v1347_v5 }
 0x373   : > { %v1470_v56 = vor.u32 1.1754944e-38, %v1469_v50 }
 0x374   : > { %vm1468_vm10 = vcmp.eq.f32.partialorder %v1467_v10, 8.507059e+37 }
 0x377   : > { %v1922_v11 = vpop.eup %1921 }
 0x378   : > { %v1459_v34 = vmul.f32 %v1922_v11, %v1347_v5  ;;  %vm1464_vm7 = vweird.f32 %v1922_v11 }
 0x379   : > { %vm1465_vm9 = vmor %vm1463_vm8, %vm1464_vm7 }
 0x37a   : > { %v1460_v28 = vsub.f32 1.0, %v1459_v34 }
 0x37c   : > { %v1461_v38 = vmul.f32 %v1922_v11, %v1460_v28 }
 0x37e   : > { %v1462_v37 = vadd.f32 %v1922_v11, %v1461_v38 }
 0x380   : > { %v1466_v60 = vsel %vm1465_vm9, %v1922_v11, %v1462_v37 }
 0x381   : > { %v1471_v24 = vsel %vm1468_vm10, %v1470_v56, %v1466_v60 }
 0x3b5   : > { %v1369_v9 = vpop.f32.mrf.mxu2 }
 0x3bf   : > { %v1372_v61 = vpop.f32.mrf.mxu2 }
 0x3c7   : > { %v1392_v51 = vpop.f32.mrf.mxu3 }
 0x3c8   : > { %v1393_v33 = vadd.f32 %v1392_v51, %v1369_v9 }
 0x3ca   : > { %v1473_v47 = vmul.f32 %v1457_v18, %v1393_v33 }
 0x3cc   : > { %v1478_v58 = vmul.f32 %v1477_v39, %v1473_v47 }
 0x3ce   : > { %v1482_v15 = vadd.f32 %v1923_v62, %v1478_v58 }
 0x3cf   : > { %v1395_v26 = vpop.f32.mrf.mxu3 }
 0x3d0   : > { %1486 = vst [vmem:[%s2856_s22] sm:$0xff] %v1482_v15  ;;  %v1396_v55 = vadd.f32 %v1395_v26, %v1372_v61 }
 0x3d2   : > { %v1475_v53 = vmul.f32 %v1457_v18, %v1396_v55 }
 0x3d4   : > { %v1480_v8 = vmul.f32 %v1477_v39, %v1475_v53 }
 0x3d6   : > { %v1484_v57 = vadd.f32 %v1924_v48, %v1480_v8 }
 0x3d7   : > { %v1415_v20 = vpop.f32.mrf.mxu2 }
 0x3d8   : > { %1488 = vst [vmem:[%s2856_s22 + $0x10] sm:$0xff] %v1484_v57 }
 0x3df   : > { %v1418_v36 = vpop.f32.mrf.mxu2 }
 0x3e7   : > { %v1438_v63 = vpop.f32.mrf.mxu3 }
 0x3e8   : > { %v1439_v19 = vadd.f32 %v1438_v63, %v1415_v20 }
 0x3ea   : > { %v1474_v14 = vmul.f32 %v1471_v24, %v1439_v19 }
 0x3ec   : > { %v1479_v45 = vmul.f32 %v1477_v39, %v1474_v14 }
 0x3ee   : > { %v1483_v12 = vadd.f32 %v1925_v22, %v1479_v45 }
 0x3ef   : > { %v1441_v52 = vpop.f32.mrf.mxu3 }
 0x3f0   : > { %1487 = vst [vmem:[%s2856_s22 + $0x8] sm:$0xff] %v1483_v12  ;;  %v1442_v46 = vadd.f32 %v1441_v52, %v1418_v36 }
 0x3f2   : > { %v1476_v49 = vmul.f32 %v1471_v24, %v1442_v46 }
 0x3f4   : > { %v1481_v0 = vmul.f32 %v1477_v39, %v1476_v49 }
 0x3f6   : > { %v1485_v44 = vadd.f32 %v1926_v17, %v1481_v0 }
 0x3f8   : > { %1489 = vst [vmem:[%s2856_s22 + $0x18] sm:$0xff] %v1485_v44 }
 0x3f9   : > { %2014 = shalt.err (!%p2011_p13)
}
 0x3fa   : > { %s2078_s25 = smov 256   ;;  %s2079_s13 = smov 16  }
 0x3fb   : > { %1720 = dma.vmem_to_hbm [thread:$0]  (%p2184_p9), %s1506_s21, 512, %s1508_s29, %s1491_s14, %s2078_s25, %s2078_s25, %s2079_s13  }
 0x3fc PF: > { %s1522_s24 = sand.u32 1, %s2053_s11   ;;  %p1730_p0 = pnand %p1621_p12, %p2191_p11 }
 0x3fd   : > { %s1523_s22 = scalar_lea.sflag [#allocation7], %s1522_s24 }
 0x3fe   : > { %p1731_p1 = pneg %p1730_p0 }
 0x400   : > { %2048 = dma.done.wait (%p1731_p1), %s1523_s22, 512  }
 0x401   : > { %2050 = vsyncadd (%p1731_p1), %s1523_s22, 4294966784  ;;  %s29_s16 = sadd.s32 1, %s2073_s16   ;;  %s2987_s18 = sld [smem:[#allocation14_spill]] }
 0x402   : > { %p26_p2 = scmp.ge.s32.totalorder %s29_s16, 4   ;;  %s2988_s13 = sld [smem:[#allocation17_spill]] }
 0x403   : > { %s2989_s14 = sld [smem:[#allocation15_spill]]  ;;  %s2991_s11 = smov %s2057_s12 }
 0x404   : > { %s2990_s15 = sld [smem:[#allocation16_spill]]  ;;  %28 = sbr.rel (!%p26_p2) target bundleno = 11 (0xb), region = 118 }
 0x407   : > { %s2992_s12 = smov %s2987_s18 }
 0x409   :  { %1529 = vsyncpa [#allocation6], 1 }
 0x40a   :  { %1531 = vsyncpa [#allocation6 + $0x1], 1 }
 0x40b   :  { %1532 = vsyncpa [#allocation9], 1 }
 0x40c   :  { %1534 = vsyncpa [#allocation9 + $0x1], 1 }
 0x40d   :  { %1535 = vsyncpa [#allocation7], 1 }
 0x40e   :  { %1537 = vsyncpa [#allocation7 + $0x1], 1 }

</bundles_post_ra>
